<compile_context>
chip_gen: v7x
topology: tpu7x:2x2x1
jax: 0.10.0
libtpu: 0.0.40
codegen_flags: <defaults>
</compile_context>

<pallas_src>
import jax
import jax.numpy as jnp
from jax import lax
from jax.experimental import pallas as pl
from jax.experimental.pallas import tpu as pltpu

# --- synthetic-BERT sizes (small, consistent with the module's forward) ----------
B, S, H, NH, C = 2, 8, 32, 4, 6         # batch, seq, hidden, heads, num_classes
DH = H // NH                            # head dim
FF = 4 * H                              # feed-forward dim
VOCAB = 64
N_SEG = 2
EPS = 1e-12

# --- packed-parameter layout: one zero-padded (N_ROWS, PW) f32 slab ---------------
PW = 128                                # packed lane width (>= 3H, FF, C); lane-dense
assert PW >= max(3 * H, FF, C)
R_WQKV = 0                              # rows [0, H)        cols [0, 3H) : concat(wq|wk|wv)
R_W1 = R_WQKV + H                       # rows [H, 2H)       cols [0, FF)
R_W2 = R_W1 + H                         # rows [2H, 2H+FF)   cols [0, H)
R_WO = R_W2 + FF                        # cols [0, H)
R_WP = R_WO + H                         # cols [0, H)
R_WC = R_WP + H                         # cols [0, C), zero-padded to PW (lane-dense logits)
R_VEC = R_WC + H                        # one 1-D parameter per row below
(V_LN_E_G, V_LN_E_B, V_BQKV, V_BO, V_LN1_G, V_LN1_B,
 V_B1, V_B2, V_LN2_G, V_LN2_B, V_BP, V_BC) = range(R_VEC, R_VEC + 12)
N_ROWS = ((R_VEC + 12 + 7) // 8) * 8    # pad rows to a multiple of 8 sublanes


def _ln(x, g, b, eps=EPS):
    mu = jnp.mean(x, axis=-1, keepdims=True)
    var = jnp.mean((x - mu) ** 2, axis=-1, keepdims=True)
    return (x - mu) * lax.rsqrt(var + eps) * g + b


# ---------------------------------- kernel ---------------------------------------
def ebert_kernel(vl_ref,                 # scalar-prefetch: valid_length (B,) int32 in SMEM
                 x_ref,                  # (B*S, H) embedded tokens (whole batch)
                 p_ref,                  # (N_ROWS, PW) packed parameter slab
                 out_ref):               # (B, PW) lane-dense logits (first C cols valid)
    # ---- unpack parameters: static slices of the single packed VMEM slab ----
    wqkv = p_ref[R_WQKV:R_WQKV + H, 0:3 * H]      # (H, 3H)
    w1 = p_ref[R_W1:R_W1 + H, 0:FF]               # (H, FF)
    w2 = p_ref[R_W2:R_W2 + FF, 0:H]               # (FF, H)
    wo = p_ref[R_WO:R_WO + H, 0:H]                # (H, H)
    wp = p_ref[R_WP:R_WP + H, 0:H]                # (H, H)
    wc = p_ref[R_WC:R_WC + H, :]                  # (H, PW), zero beyond col C

    ln_e_g = p_ref[V_LN_E_G:V_LN_E_G + 1, 0:H]
    ln_e_b = p_ref[V_LN_E_B:V_LN_E_B + 1, 0:H]
    bqkv = p_ref[V_BQKV:V_BQKV + 1, 0:3 * H]
    bo = p_ref[V_BO:V_BO + 1, 0:H]
    ln1_g = p_ref[V_LN1_G:V_LN1_G + 1, 0:H]
    ln1_b = p_ref[V_LN1_B:V_LN1_B + 1, 0:H]
    b1 = p_ref[V_B1:V_B1 + 1, 0:FF]
    b2 = p_ref[V_B2:V_B2 + 1, 0:H]
    ln2_g = p_ref[V_LN2_G:V_LN2_G + 1, 0:H]
    ln2_b = p_ref[V_LN2_B:V_LN2_B + 1, 0:H]
    bp = p_ref[V_BP:V_BP + 1, 0:H]
    bc = p_ref[V_BC:V_BC + 1, :]                  # (1, PW), zero beyond col C

    # ---- embedding layernorm over the whole (B*S, H) batch ----
    x = _ln(x_ref[...], ln_e_g, ln_e_b)           # (B*S, H)

    # ---- fused QKV projection: one (B*S, H) @ (H, 3H) matmul ----
    qkv = jnp.dot(x, wqkv, preferred_element_type=jnp.float32) + bqkv   # (B*S, 3H)
    qkv3 = qkv.reshape(B, S, 3 * H)               # free split of the sublane dim

    # ---- gen_attention_mask: key positions < valid_length attended, rest -1e9 ----
    # NOTE: assumes valid_length >= 1 (a fully-masked row softmaxes to uniform garbage).
    kidx = lax.broadcasted_iota(jnp.int32, (B, 1, S), 2)
    bidx = lax.broadcasted_iota(jnp.int32, (B, 1, S), 0)
    vl_b = jnp.zeros((B, 1, S), jnp.int32)
    for b in range(B):                            # B is tiny & static
        vl_b = jnp.where(bidx == b, vl_ref[b], vl_b)
    neg_bias = jnp.where(kidx < vl_b, 0.0, -1e9).astype(jnp.float32)    # (B, 1, S)

    # ---- multi-head self-attention, batched over B, small static head loop ----
    scale = 1.0 / (DH ** 0.5)
    attn = jnp.zeros((B * S, H), jnp.float32)
    for h in range(NH):
        qh = qkv3[:, :, h * DH:(h + 1) * DH]                       # (B, S, DH)
        kh = qkv3[:, :, H + h * DH:H + (h + 1) * DH]
        vh = qkv3[:, :, 2 * H + h * DH:2 * H + (h + 1) * DH]
        sc = jnp.einsum("bqd,bkd->bqk", qh, kh,
                        preferred_element_type=jnp.float32) * scale + neg_bias
        sc = sc - jnp.max(sc, axis=-1, keepdims=True)
        pr = jnp.exp(sc)
        pr = pr * pl.reciprocal(jnp.sum(pr, axis=-1, keepdims=True), approx=True)
        ctx = jnp.einsum("bqk,bkd->bqd", pr, vh,
                         preferred_element_type=jnp.float32)        # (B, S, DH)
        # concat_h(ctx_h) @ Wo == sum_h ctx_h @ Wo[h*DH:(h+1)*DH, :]
        attn = attn + jnp.dot(ctx.reshape(B * S, DH), wo[h * DH:(h + 1) * DH, :],
                              preferred_element_type=jnp.float32)
    attn = attn + bo

    # ---- add & norm, FFN, add & norm ----
    h1 = _ln(x + attn, ln1_g, ln1_b)
    ff = jnp.dot(h1, w1, preferred_element_type=jnp.float32) + b1
    # TODO(synk): HF BERT uses exact erf GELU; tanh approximation used (matches JAX ref here).
    ff = jax.nn.gelu(ff)
    ff = jnp.dot(ff, w2, preferred_element_type=jnp.float32) + b2
    h2 = _ln(h1 + ff, ln2_g, ln2_b)

    # ---- pooler ([CLS] token) + classifier; lane-dense (B, PW) logits ----
    cls = h2.reshape(B, S, H)[:, 0, :]                              # (B, H)
    pooled = jnp.tanh(jnp.dot(cls, wp, preferred_element_type=jnp.float32) + bp)
    # TODO(synk): dropout (dr_rate) skipped — module default dr_rate=None / eval semantics.
    out_ref[...] = jnp.dot(pooled, wc, preferred_element_type=jnp.float32) + bc


# --------------------------- host-side parameter packing --------------------------
def pack_params(p):
    P = jnp.zeros((N_ROWS, PW), jnp.float32)
    P = P.at[R_WQKV:R_WQKV + H, 0:3 * H].set(
        jnp.concatenate([p["wq"], p["wk"], p["wv"]], axis=1))
    P = P.at[R_W1:R_W1 + H, 0:FF].set(p["w1"])
    P = P.at[R_W2:R_W2 + FF, 0:H].set(p["w2"])
    P = P.at[R_WO:R_WO + H, 0:H].set(p["wo"])
    P = P.at[R_WP:R_WP + H, 0:H].set(p["wp"])
    P = P.at[R_WC:R_WC + H, 0:C].set(p["wc"])
    P = P.at[V_LN_E_G, 0:H].set(p["ln_e_g"][0])
    P = P.at[V_LN_E_B, 0:H].set(p["ln_e_b"][0])
    P = P.at[V_BQKV, 0:3 * H].set(jnp.concatenate([p["bq"][0], p["bk"][0], p["bv"][0]]))
    P = P.at[V_BO, 0:H].set(p["bo"][0])
    P = P.at[V_LN1_G, 0:H].set(p["ln1_g"][0])
    P = P.at[V_LN1_B, 0:H].set(p["ln1_b"][0])
    P = P.at[V_B1, 0:FF].set(p["b1"][0])
    P = P.at[V_B2, 0:H].set(p["b2"][0])
    P = P.at[V_LN2_G, 0:H].set(p["ln2_g"][0])
    P = P.at[V_LN2_B, 0:H].set(p["ln2_b"][0])
    P = P.at[V_BP, 0:H].set(p["bp"][0])
    P = P.at[V_BC, 0:C].set(p["bc"][0])
    return P


# --------------------------------- wrapper ---------------------------------------
@jax.jit
def ebert_classifier(token_ids, valid_length, segment_ids,
                     tok_emb, seg_emb, pos_emb, packed):
    # Embedding lookup is glue (gather) — plain JAX; kernel sees (B*S, H) rows.
    x = (tok_emb[token_ids] + seg_emb[segment_ids]
         + pos_emb[None, :, :]).astype(jnp.float32)                 # (B, S, H)
    x = x.reshape(B * S, H)

    out = pl.pallas_call(
        ebert_kernel,
        out_shape=jax.ShapeDtypeStruct((B, PW), jnp.float32),
        grid_spec=pltpu.PrefetchScalarGridSpec(
            num_scalar_prefetch=1,
            grid=(1,),                          # single step: whole batch at once
            in_specs=[
                pl.BlockSpec((B * S, H), lambda i, vl: (0, 0)),
                pl.BlockSpec((N_ROWS, PW), lambda i, vl: (0, 0)),
            ],
            out_specs=pl.BlockSpec((B, PW), lambda i, vl: (0, 0)),
        ),
        compiler_params=pltpu.CompilerParams(dimension_semantics=("arbitrary",)),
    )(valid_length.astype(jnp.int32), x, packed)
    return out[:, :C]                                               # (B, C)


# ------------------------------ pure-JAX reference --------------------------------
def ref_forward(token_ids, valid_length, segment_ids, p):
    x = (p["tok_emb"][token_ids] + p["seg_emb"][segment_ids] + p["pos_emb"][None]).astype(jnp.float32)
    x = _ln(x, p["ln_e_g"], p["ln_e_b"])
    q = x @ p["wq"] + p["bq"]
    k = x @ p["wk"] + p["bk"]
    v = x @ p["wv"] + p["bv"]
    qh = q.reshape(B, S, NH, DH).transpose(0, 2, 1, 3)
    kh = k.reshape(B, S, NH, DH).transpose(0, 2, 1, 3)
    vh = v.reshape(B, S, NH, DH).transpose(0, 2, 1, 3)
    sc = jnp.einsum("bhqd,bhkd->bhqk", qh, kh) / (DH ** 0.5)
    key_mask = (jnp.arange(S)[None, :] < valid_length[:, None])
    sc = sc + jnp.where(key_mask[:, None, None, :], 0.0, -1e9)
    attn = jax.nn.softmax(sc, axis=-1)
    ctx = jnp.einsum("bhqk,bhkd->bhqd", attn, vh).transpose(0, 2, 1, 3).reshape(B, S, H)
    attn_out = ctx @ p["wo"] + p["bo"]
    h1 = _ln(x + attn_out, p["ln1_g"], p["ln1_b"])
    ff = jax.nn.gelu(h1 @ p["w1"] + p["b1"])
    ff = ff @ p["w2"] + p["b2"]
    h2 = _ln(h1 + ff, p["ln2_g"], p["ln2_b"])
    pooled = jnp.tanh(h2[:, 0, :] @ p["wp"] + p["bp"])
    return pooled @ p["wc"] + p["bc"]


# ------------------------------ deterministic params -------------------------------
def make_params(key):
    def nrm(k, shape, std=0.02):
        return (std * jax.random.normal(k, shape)).astype(jnp.float32)

    ks = jax.random.split(key, 16)
    p = {
        "tok_emb": nrm(ks[0], (VOCAB, H)),
        "seg_emb": nrm(ks[1], (N_SEG, H)),
        "pos_emb": nrm(ks[2], (S, H)),
        "ln_e_g": jnp.ones((1, H), jnp.float32), "ln_e_b": jnp.zeros((1, H), jnp.float32),
        "wq": nrm(ks[3], (H, H)), "bq": jnp.zeros((1, H), jnp.float32),
        "wk": nrm(ks[4], (H, H)), "bk": jnp.zeros((1, H), jnp.float32),
        "wv": nrm(ks[5], (H, H)), "bv": jnp.zeros((1, H), jnp.float32),
        "wo": nrm(ks[6], (H, H)), "bo": jnp.zeros((1, H), jnp.float32),
        "ln1_g": jnp.ones((1, H), jnp.float32), "ln1_b": jnp.zeros((1, H), jnp.float32),
        "w1": nrm(ks[7], (H, FF)), "b1": jnp.zeros((1, FF), jnp.float32),
        "w2": nrm(ks[8], (FF, H)), "b2": jnp.zeros((1, H), jnp.float32),
        "ln2_g": jnp.ones((1, H), jnp.float32), "ln2_b": jnp.zeros((1, H), jnp.float32),
        "wp": nrm(ks[9], (H, H)), "bp": jnp.zeros((1, H), jnp.float32),
        "wc": nrm(ks[10], (H, C)), "bc": jnp.zeros((1, C), jnp.float32),
    }
    return p


if __name__ == "__main__":
    key = jax.random.PRNGKey(0)
    k_tok, k_seg, k_par = jax.random.split(key, 3)

    token_ids = jax.random.randint(k_tok, (B, S), 0, VOCAB, dtype=jnp.int32)
    segment_ids = jax.random.randint(k_seg, (B, S), 0, N_SEG, dtype=jnp.int32)
    valid_length = jnp.array([5, 8], dtype=jnp.int32)   # assumed >= 1
    params = make_params(k_par)
    packed = jax.block_until_ready(pack_params(params))  # pack once, outside the hot path

    logits = ebert_classifier(token_ids, valid_length, segment_ids,
                              params["tok_emb"], params["seg_emb"], params["pos_emb"],
                              packed)
    logits = jax.block_until_ready(logits)

    ref = ref_forward(token_ids, valid_length, segment_ids, params)
    assert logits.shape == (B, C)
    assert jnp.allclose(logits, ref, rtol=2e-3, atol=2e-3), (logits, ref)

    print("KERNEL_OK")
</pallas_src>

<mosaic_0001>
module attributes {stable_mosaic.version = 11 : i64} {
  func.func @ebert_kernel(%arg0: i32, %arg1: memref<2xi32, #tpu.memory_space<smem>>, %arg2: memref<16x32xf32, #tpu.memory_space<vmem>>, %arg3: memref<304x128xf32, #tpu.memory_space<vmem>>, %arg4: memref<2x128xf32, #tpu.memory_space<vmem>>) attributes {dimension_semantics = [#tpu.dimension_semantics<arbitrary>], iteration_bounds = array<i64: 1>, scalar_prefetch = 1 : i64, scratch_operands = 0 : i64, tpu.core_type = #tpu.core_type<tc>, window_params = [{pipeline_mode = #tpu.pipeline_mode<synchronous>, transform_indices = @transform_0, window_bounds = array<i64: 16, 32>}, {pipeline_mode = #tpu.pipeline_mode<synchronous>, transform_indices = @transform_1, window_bounds = array<i64: 304, 128>}, {pipeline_mode = #tpu.pipeline_mode<synchronous>, transform_indices = @transform_2, window_bounds = array<i64: 2, 128>}]} {
    %c0 = arith.constant 0 : index
    %c0_0 = arith.constant 0 : index
    %0 = vector.load %arg3[%c0, %c0_0] : memref<304x128xf32, #tpu.memory_space<vmem>>, vector<32x96xf32>
    %c32 = arith.constant 32 : index
    %c0_1 = arith.constant 0 : index
    %1 = vector.load %arg3[%c32, %c0_1] : memref<304x128xf32, #tpu.memory_space<vmem>>, vector<32x128xf32>
    %c64 = arith.constant 64 : index
    %c0_2 = arith.constant 0 : index
    %2 = vector.load %arg3[%c64, %c0_2] : memref<304x128xf32, #tpu.memory_space<vmem>>, vector<128x32xf32>
    %c192 = arith.constant 192 : index
    %c0_3 = arith.constant 0 : index
    %3 = vector.load %arg3[%c192, %c0_3] : memref<304x128xf32, #tpu.memory_space<vmem>>, vector<32x32xf32>
    %c224 = arith.constant 224 : index
    %c0_4 = arith.constant 0 : index
    %4 = vector.load %arg3[%c224, %c0_4] : memref<304x128xf32, #tpu.memory_space<vmem>>, vector<32x32xf32>
    %c256 = arith.constant 256 : index
    %c0_5 = arith.constant 0 : index
    %5 = vector.load %arg3[%c256, %c0_5] : memref<304x128xf32, #tpu.memory_space<vmem>>, vector<32x128xf32>
    %c288 = arith.constant 288 : index
    %c0_6 = arith.constant 0 : index
    %6 = vector.load %arg3[%c288, %c0_6] : memref<304x128xf32, #tpu.memory_space<vmem>>, vector<1x32xf32>
    %c289 = arith.constant 289 : index
    %c0_7 = arith.constant 0 : index
    %7 = vector.load %arg3[%c289, %c0_7] : memref<304x128xf32, #tpu.memory_space<vmem>>, vector<1x32xf32>
    %c290 = arith.constant 290 : index
    %c0_8 = arith.constant 0 : index
    %8 = vector.load %arg3[%c290, %c0_8] : memref<304x128xf32, #tpu.memory_space<vmem>>, vector<1x96xf32>
    %c291 = arith.constant 291 : index
    %c0_9 = arith.constant 0 : index
    %9 = vector.load %arg3[%c291, %c0_9] : memref<304x128xf32, #tpu.memory_space<vmem>>, vector<1x32xf32>
    %c292 = arith.constant 292 : index
    %c0_10 = arith.constant 0 : index
    %10 = vector.load %arg3[%c292, %c0_10] : memref<304x128xf32, #tpu.memory_space<vmem>>, vector<1x32xf32>
    %c293 = arith.constant 293 : index
    %c0_11 = arith.constant 0 : index
    %11 = vector.load %arg3[%c293, %c0_11] : memref<304x128xf32, #tpu.memory_space<vmem>>, vector<1x32xf32>
    %c294 = arith.constant 294 : index
    %c0_12 = arith.constant 0 : index
    %12 = vector.load %arg3[%c294, %c0_12] : memref<304x128xf32, #tpu.memory_space<vmem>>, vector<1x128xf32>
    %c295 = arith.constant 295 : index
    %c0_13 = arith.constant 0 : index
    %13 = vector.load %arg3[%c295, %c0_13] : memref<304x128xf32, #tpu.memory_space<vmem>>, vector<1x32xf32>
    %c296 = arith.constant 296 : index
    %c0_14 = arith.constant 0 : index
    %14 = vector.load %arg3[%c296, %c0_14] : memref<304x128xf32, #tpu.memory_space<vmem>>, vector<1x32xf32>
    %c297 = arith.constant 297 : index
    %c0_15 = arith.constant 0 : index
    %15 = vector.load %arg3[%c297, %c0_15] : memref<304x128xf32, #tpu.memory_space<vmem>>, vector<1x32xf32>
    %c298 = arith.constant 298 : index
    %c0_16 = arith.constant 0 : index
    %16 = vector.load %arg3[%c298, %c0_16] : memref<304x128xf32, #tpu.memory_space<vmem>>, vector<1x32xf32>
    %c299 = arith.constant 299 : index
    %c0_17 = arith.constant 0 : index
    %17 = vector.load %arg3[%c299, %c0_17] : memref<304x128xf32, #tpu.memory_space<vmem>>, vector<1x128xf32>
    %c0_18 = arith.constant 0 : index
    %c0_19 = arith.constant 0 : index
    %18 = vector.load %arg2[%c0_18, %c0_19] : memref<16x32xf32, #tpu.memory_space<vmem>>, vector<16x32xf32>
    %cst = arith.constant dense<0.000000e+00> : vector<16xf32>
    %19 = vector.multi_reduction <add>, %18, %cst [1] : vector<16x32xf32> to vector<16xf32>
    %20 = vector.shape_cast %19 : vector<16xf32> to vector<16x1xf32>
    %cst_20 = arith.constant 3.200000e+01 : f32
    %21 = vector.broadcast %cst_20 : f32 to vector<16x1xf32>
    %22 = arith.divf %20, %21 : vector<16x1xf32>
    %23 = vector.broadcast %22 : vector<16x1xf32> to vector<16x32xf32>
    %24 = arith.subf %18, %23 : vector<16x32xf32>
    %25 = arith.mulf %24, %24 : vector<16x32xf32>
    %cst_21 = arith.constant dense<0.000000e+00> : vector<16xf32>
    %26 = vector.multi_reduction <add>, %25, %cst_21 [1] : vector<16x32xf32> to vector<16xf32>
    %27 = vector.shape_cast %26 : vector<16xf32> to vector<16x1xf32>
    %cst_22 = arith.constant 3.200000e+01 : f32
    %28 = vector.broadcast %cst_22 : f32 to vector<16x1xf32>
    %29 = arith.divf %27, %28 : vector<16x1xf32>
    %30 = vector.broadcast %22 : vector<16x1xf32> to vector<16x32xf32>
    %31 = arith.subf %18, %30 : vector<16x32xf32>
    %cst_23 = arith.constant 9.99999996E-13 : f32
    %32 = vector.broadcast %cst_23 : f32 to vector<16x1xf32>
    %33 = arith.addf %29, %32 : vector<16x1xf32>
    %34 = math.rsqrt %33 : vector<16x1xf32>
    %35 = vector.broadcast %34 : vector<16x1xf32> to vector<16x32xf32>
    %36 = arith.mulf %31, %35 : vector<16x32xf32>
    %37 = vector.broadcast %6 : vector<1x32xf32> to vector<16x32xf32>
    %38 = arith.mulf %36, %37 : vector<16x32xf32>
    %39 = vector.broadcast %7 : vector<1x32xf32> to vector<16x32xf32>
    %40 = arith.addf %38, %39 : vector<16x32xf32>
    %cst_24 = arith.constant dense<0.000000e+00> : vector<16x96xf32>
    %41 = tpu.matmul %40, %0, %cst_24 {dimension_numbers = #tpu.dot_dimension_numbers<[1], [0], [0], [1], [0, 0, 1, 1], [], []>} : vector<16x32xf32>, vector<32x96xf32>, vector<16x96xf32> -> vector<16x96xf32>
    %42 = vector.broadcast %8 : vector<1x96xf32> to vector<16x96xf32>
    %43 = arith.addf %41, %42 : vector<16x96xf32>
    %44 = vector.shape_cast %43 : vector<16x96xf32> to vector<2x8x96xf32>
    %45 = tpu.iota {dimensions = array<i32: 2>} : vector<2x1x8xi32>
    %46 = tpu.iota {dimensions = array<i32: 0>} : vector<2x1x8xi32>
    %c0_i32 = arith.constant 0 : i32
    %47 = vector.broadcast %c0_i32 : i32 to vector<2x1x8xi32>
    %c0_i32_25 = arith.constant 0 : i32
    %48 = vector.broadcast %c0_i32_25 : i32 to vector<2x1x8xi32>
    %49 = arith.cmpi eq, %46, %48 : vector<2x1x8xi32>
    %c0_26 = arith.constant 0 : index
    %50 = memref.load %arg1[%c0_26] : memref<2xi32, #tpu.memory_space<smem>>
    %51 = vector.broadcast %50 : i32 to vector<2x1x8xi32>
    %52 = arith.select %49, %51, %47 : vector<2x1x8xi1>, vector<2x1x8xi32>
    %c1_i32 = arith.constant 1 : i32
    %53 = vector.broadcast %c1_i32 : i32 to vector<2x1x8xi32>
    %54 = arith.cmpi eq, %46, %53 : vector<2x1x8xi32>
    %c1 = arith.constant 1 : index
    %55 = memref.load %arg1[%c1] : memref<2xi32, #tpu.memory_space<smem>>
    %56 = vector.broadcast %55 : i32 to vector<2x1x8xi32>
    %57 = arith.select %54, %56, %52 : vector<2x1x8xi1>, vector<2x1x8xi32>
    %58 = arith.cmpi slt, %45, %57 : vector<2x1x8xi32>
    %cst_27 = arith.constant 0.000000e+00 : f32
    %cst_28 = arith.constant -1.000000e+09 : f32
    %59 = vector.broadcast %cst_27 : f32 to vector<2x1x8xf32>
    %60 = vector.broadcast %cst_28 : f32 to vector<2x1x8xf32>
    %61 = arith.select %58, %59, %60 : vector<2x1x8xi1>, vector<2x1x8xf32>
    %cst_29 = arith.constant 0.000000e+00 : f32
    %62 = vector.broadcast %cst_29 : f32 to vector<16x32xf32>
    %63 = vector.extract_strided_slice %44 {offsets = [0, 0, 0], sizes = [2, 8, 8], strides = [1, 1, 1]} : vector<2x8x96xf32> to vector<2x8x8xf32>
    %64 = vector.extract_strided_slice %44 {offsets = [0, 0, 32], sizes = [2, 8, 8], strides = [1, 1, 1]} : vector<2x8x96xf32> to vector<2x8x8xf32>
    %65 = vector.extract_strided_slice %44 {offsets = [0, 0, 64], sizes = [2, 8, 8], strides = [1, 1, 1]} : vector<2x8x96xf32> to vector<2x8x8xf32>
    "tpu.trace_start"() <{level = 10 : i32, message = "bqd,bkd->bqk"}> : () -> ()
    %cst_30 = arith.constant dense<0.000000e+00> : vector<2x8x8xf32>
    %66 = tpu.matmul %63, %64, %cst_30 {dimension_numbers = #tpu.dot_dimension_numbers<[2], [2], [1], [1], [0, 0, 0, 1, 1, 1], [0], [0]>} : vector<2x8x8xf32>, vector<2x8x8xf32>, vector<2x8x8xf32> -> vector<2x8x8xf32>
    "tpu.trace_stop"() : () -> ()
    %cst_31 = arith.constant 0.353553385 : f32
    %67 = vector.broadcast %cst_31 : f32 to vector<2x8x8xf32>
    %68 = arith.mulf %66, %67 : vector<2x8x8xf32>
    %69 = vector.broadcast %61 : vector<2x1x8xf32> to vector<2x8x8xf32>
    %70 = arith.addf %68, %69 : vector<2x8x8xf32>
    %cst_32 = arith.constant dense<0xFF800000> : vector<2x8xf32>
    %71 = vector.multi_reduction <maximumf>, %70, %cst_32 [2] : vector<2x8x8xf32> to vector<2x8xf32>
    %72 = vector.shape_cast %71 : vector<2x8xf32> to vector<2x8x1xf32>
    %73 = vector.broadcast %72 : vector<2x8x1xf32> to vector<2x8x8xf32>
    %74 = arith.subf %70, %73 : vector<2x8x8xf32>
    %75 = math.exp %74 : vector<2x8x8xf32>
    %cst_33 = arith.constant dense<0.000000e+00> : vector<2x8xf32>
    %76 = vector.multi_reduction <add>, %75, %cst_33 [2] : vector<2x8x8xf32> to vector<2x8xf32>
    %77 = vector.shape_cast %76 : vector<2x8xf32> to vector<2x8x1xf32>
    %78 = tpu.reciprocal %77 {approx = true} : vector<2x8x1xf32> -> vector<2x8x1xf32>
    %79 = vector.broadcast %78 : vector<2x8x1xf32> to vector<2x8x8xf32>
    %80 = arith.mulf %75, %79 : vector<2x8x8xf32>
    "tpu.trace_start"() <{level = 10 : i32, message = "bqk,bkd->bqd"}> : () -> ()
    %cst_34 = arith.constant dense<0.000000e+00> : vector<2x8x8xf32>
    %81 = tpu.matmul %80, %65, %cst_34 {dimension_numbers = #tpu.dot_dimension_numbers<[2], [1], [1], [2], [0, 0, 0, 1, 1, 2], [0], [0]>} : vector<2x8x8xf32>, vector<2x8x8xf32>, vector<2x8x8xf32> -> vector<2x8x8xf32>
    "tpu.trace_stop"() : () -> ()
    %82 = vector.shape_cast %81 : vector<2x8x8xf32> to vector<16x8xf32>
    %83 = vector.extract_strided_slice %3 {offsets = [0, 0], sizes = [8, 32], strides = [1, 1]} : vector<32x32xf32> to vector<8x32xf32>
    %cst_35 = arith.constant dense<0.000000e+00> : vector<16x32xf32>
    %84 = tpu.matmul %82, %83, %cst_35 {dimension_numbers = #tpu.dot_dimension_numbers<[1], [0], [0], [1], [0, 0, 1, 1], [], []>} : vector<16x8xf32>, vector<8x32xf32>, vector<16x32xf32> -> vector<16x32xf32>
    %85 = arith.addf %62, %84 : vector<16x32xf32>
    %86 = vector.extract_strided_slice %44 {offsets = [0, 0, 8], sizes = [2, 8, 8], strides = [1, 1, 1]} : vector<2x8x96xf32> to vector<2x8x8xf32>
    %87 = vector.extract_strided_slice %44 {offsets = [0, 0, 40], sizes = [2, 8, 8], strides = [1, 1, 1]} : vector<2x8x96xf32> to vector<2x8x8xf32>
    %88 = vector.extract_strided_slice %44 {offsets = [0, 0, 72], sizes = [2, 8, 8], strides = [1, 1, 1]} : vector<2x8x96xf32> to vector<2x8x8xf32>
    "tpu.trace_start"() <{level = 10 : i32, message = "bqd,bkd->bqk"}> : () -> ()
    %cst_36 = arith.constant dense<0.000000e+00> : vector<2x8x8xf32>
    %89 = tpu.matmul %86, %87, %cst_36 {dimension_numbers = #tpu.dot_dimension_numbers<[2], [2], [1], [1], [0, 0, 0, 1, 1, 1], [0], [0]>} : vector<2x8x8xf32>, vector<2x8x8xf32>, vector<2x8x8xf32> -> vector<2x8x8xf32>
    "tpu.trace_stop"() : () -> ()
    %cst_37 = arith.constant 0.353553385 : f32
    %90 = vector.broadcast %cst_37 : f32 to vector<2x8x8xf32>
    %91 = arith.mulf %89, %90 : vector<2x8x8xf32>
    %92 = vector.broadcast %61 : vector<2x1x8xf32> to vector<2x8x8xf32>
    %93 = arith.addf %91, %92 : vector<2x8x8xf32>
    %cst_38 = arith.constant dense<0xFF800000> : vector<2x8xf32>
    %94 = vector.multi_reduction <maximumf>, %93, %cst_38 [2] : vector<2x8x8xf32> to vector<2x8xf32>
    %95 = vector.shape_cast %94 : vector<2x8xf32> to vector<2x8x1xf32>
    %96 = vector.broadcast %95 : vector<2x8x1xf32> to vector<2x8x8xf32>
    %97 = arith.subf %93, %96 : vector<2x8x8xf32>
    %98 = math.exp %97 : vector<2x8x8xf32>
    %cst_39 = arith.constant dense<0.000000e+00> : vector<2x8xf32>
    %99 = vector.multi_reduction <add>, %98, %cst_39 [2] : vector<2x8x8xf32> to vector<2x8xf32>
    %100 = vector.shape_cast %99 : vector<2x8xf32> to vector<2x8x1xf32>
    %101 = tpu.reciprocal %100 {approx = true} : vector<2x8x1xf32> -> vector<2x8x1xf32>
    %102 = vector.broadcast %101 : vector<2x8x1xf32> to vector<2x8x8xf32>
    %103 = arith.mulf %98, %102 : vector<2x8x8xf32>
    "tpu.trace_start"() <{level = 10 : i32, message = "bqk,bkd->bqd"}> : () -> ()
    %cst_40 = arith.constant dense<0.000000e+00> : vector<2x8x8xf32>
    %104 = tpu.matmul %103, %88, %cst_40 {dimension_numbers = #tpu.dot_dimension_numbers<[2], [1], [1], [2], [0, 0, 0, 1, 1, 2], [0], [0]>} : vector<2x8x8xf32>, vector<2x8x8xf32>, vector<2x8x8xf32> -> vector<2x8x8xf32>
    "tpu.trace_stop"() : () -> ()
    %105 = vector.shape_cast %104 : vector<2x8x8xf32> to vector<16x8xf32>
    %106 = vector.extract_strided_slice %3 {offsets = [8, 0], sizes = [8, 32], strides = [1, 1]} : vector<32x32xf32> to vector<8x32xf32>
    %cst_41 = arith.constant dense<0.000000e+00> : vector<16x32xf32>
    %107 = tpu.matmul %105, %106, %cst_41 {dimension_numbers = #tpu.dot_dimension_numbers<[1], [0], [0], [1], [0, 0, 1, 1], [], []>} : vector<16x8xf32>, vector<8x32xf32>, vector<16x32xf32> -> vector<16x32xf32>
    %108 = arith.addf %85, %107 : vector<16x32xf32>
    %109 = vector.extract_strided_slice %44 {offsets = [0, 0, 16], sizes = [2, 8, 8], strides = [1, 1, 1]} : vector<2x8x96xf32> to vector<2x8x8xf32>
    %110 = vector.extract_strided_slice %44 {offsets = [0, 0, 48], sizes = [2, 8, 8], strides = [1, 1, 1]} : vector<2x8x96xf32> to vector<2x8x8xf32>
    %111 = vector.extract_strided_slice %44 {offsets = [0, 0, 80], sizes = [2, 8, 8], strides = [1, 1, 1]} : vector<2x8x96xf32> to vector<2x8x8xf32>
    "tpu.trace_start"() <{level = 10 : i32, message = "bqd,bkd->bqk"}> : () -> ()
    %cst_42 = arith.constant dense<0.000000e+00> : vector<2x8x8xf32>
    %112 = tpu.matmul %109, %110, %cst_42 {dimension_numbers = #tpu.dot_dimension_numbers<[2], [2], [1], [1], [0, 0, 0, 1, 1, 1], [0], [0]>} : vector<2x8x8xf32>, vector<2x8x8xf32>, vector<2x8x8xf32> -> vector<2x8x8xf32>
    "tpu.trace_stop"() : () -> ()
    %cst_43 = arith.constant 0.353553385 : f32
    %113 = vector.broadcast %cst_43 : f32 to vector<2x8x8xf32>
    %114 = arith.mulf %112, %113 : vector<2x8x8xf32>
    %115 = vector.broadcast %61 : vector<2x1x8xf32> to vector<2x8x8xf32>
    %116 = arith.addf %114, %115 : vector<2x8x8xf32>
    %cst_44 = arith.constant dense<0xFF800000> : vector<2x8xf32>
    %117 = vector.multi_reduction <maximumf>, %116, %cst_44 [2] : vector<2x8x8xf32> to vector<2x8xf32>
    %118 = vector.shape_cast %117 : vector<2x8xf32> to vector<2x8x1xf32>
    %119 = vector.broadcast %118 : vector<2x8x1xf32> to vector<2x8x8xf32>
    %120 = arith.subf %116, %119 : vector<2x8x8xf32>
    %121 = math.exp %120 : vector<2x8x8xf32>
    %cst_45 = arith.constant dense<0.000000e+00> : vector<2x8xf32>
    %122 = vector.multi_reduction <add>, %121, %cst_45 [2] : vector<2x8x8xf32> to vector<2x8xf32>
    %123 = vector.shape_cast %122 : vector<2x8xf32> to vector<2x8x1xf32>
    %124 = tpu.reciprocal %123 {approx = true} : vector<2x8x1xf32> -> vector<2x8x1xf32>
    %125 = vector.broadcast %124 : vector<2x8x1xf32> to vector<2x8x8xf32>
    %126 = arith.mulf %121, %125 : vector<2x8x8xf32>
    "tpu.trace_start"() <{level = 10 : i32, message = "bqk,bkd->bqd"}> : () -> ()
    %cst_46 = arith.constant dense<0.000000e+00> : vector<2x8x8xf32>
    %127 = tpu.matmul %126, %111, %cst_46 {dimension_numbers = #tpu.dot_dimension_numbers<[2], [1], [1], [2], [0, 0, 0, 1, 1, 2], [0], [0]>} : vector<2x8x8xf32>, vector<2x8x8xf32>, vector<2x8x8xf32> -> vector<2x8x8xf32>
    "tpu.trace_stop"() : () -> ()
    %128 = vector.shape_cast %127 : vector<2x8x8xf32> to vector<16x8xf32>
    %129 = vector.extract_strided_slice %3 {offsets = [16, 0], sizes = [8, 32], strides = [1, 1]} : vector<32x32xf32> to vector<8x32xf32>
    %cst_47 = arith.constant dense<0.000000e+00> : vector<16x32xf32>
    %130 = tpu.matmul %128, %129, %cst_47 {dimension_numbers = #tpu.dot_dimension_numbers<[1], [0], [0], [1], [0, 0, 1, 1], [], []>} : vector<16x8xf32>, vector<8x32xf32>, vector<16x32xf32> -> vector<16x32xf32>
    %131 = arith.addf %108, %130 : vector<16x32xf32>
    %132 = vector.extract_strided_slice %44 {offsets = [0, 0, 24], sizes = [2, 8, 8], strides = [1, 1, 1]} : vector<2x8x96xf32> to vector<2x8x8xf32>
    %133 = vector.extract_strided_slice %44 {offsets = [0, 0, 56], sizes = [2, 8, 8], strides = [1, 1, 1]} : vector<2x8x96xf32> to vector<2x8x8xf32>
    %134 = vector.extract_strided_slice %44 {offsets = [0, 0, 88], sizes = [2, 8, 8], strides = [1, 1, 1]} : vector<2x8x96xf32> to vector<2x8x8xf32>
    "tpu.trace_start"() <{level = 10 : i32, message = "bqd,bkd->bqk"}> : () -> ()
    %cst_48 = arith.constant dense<0.000000e+00> : vector<2x8x8xf32>
    %135 = tpu.matmul %132, %133, %cst_48 {dimension_numbers = #tpu.dot_dimension_numbers<[2], [2], [1], [1], [0, 0, 0, 1, 1, 1], [0], [0]>} : vector<2x8x8xf32>, vector<2x8x8xf32>, vector<2x8x8xf32> -> vector<2x8x8xf32>
    "tpu.trace_stop"() : () -> ()
    %cst_49 = arith.constant 0.353553385 : f32
    %136 = vector.broadcast %cst_49 : f32 to vector<2x8x8xf32>
    %137 = arith.mulf %135, %136 : vector<2x8x8xf32>
    %138 = vector.broadcast %61 : vector<2x1x8xf32> to vector<2x8x8xf32>
    %139 = arith.addf %137, %138 : vector<2x8x8xf32>
    %cst_50 = arith.constant dense<0xFF800000> : vector<2x8xf32>
    %140 = vector.multi_reduction <maximumf>, %139, %cst_50 [2] : vector<2x8x8xf32> to vector<2x8xf32>
    %141 = vector.shape_cast %140 : vector<2x8xf32> to vector<2x8x1xf32>
    %142 = vector.broadcast %141 : vector<2x8x1xf32> to vector<2x8x8xf32>
    %143 = arith.subf %139, %142 : vector<2x8x8xf32>
    %144 = math.exp %143 : vector<2x8x8xf32>
    %cst_51 = arith.constant dense<0.000000e+00> : vector<2x8xf32>
    %145 = vector.multi_reduction <add>, %144, %cst_51 [2] : vector<2x8x8xf32> to vector<2x8xf32>
    %146 = vector.shape_cast %145 : vector<2x8xf32> to vector<2x8x1xf32>
    %147 = tpu.reciprocal %146 {approx = true} : vector<2x8x1xf32> -> vector<2x8x1xf32>
    %148 = vector.broadcast %147 : vector<2x8x1xf32> to vector<2x8x8xf32>
    %149 = arith.mulf %144, %148 : vector<2x8x8xf32>
    "tpu.trace_start"() <{level = 10 : i32, message = "bqk,bkd->bqd"}> : () -> ()
    %cst_52 = arith.constant dense<0.000000e+00> : vector<2x8x8xf32>
    %150 = tpu.matmul %149, %134, %cst_52 {dimension_numbers = #tpu.dot_dimension_numbers<[2], [1], [1], [2], [0, 0, 0, 1, 1, 2], [0], [0]>} : vector<2x8x8xf32>, vector<2x8x8xf32>, vector<2x8x8xf32> -> vector<2x8x8xf32>
    "tpu.trace_stop"() : () -> ()
    %151 = vector.shape_cast %150 : vector<2x8x8xf32> to vector<16x8xf32>
    %152 = vector.extract_strided_slice %3 {offsets = [24, 0], sizes = [8, 32], strides = [1, 1]} : vector<32x32xf32> to vector<8x32xf32>
    %cst_53 = arith.constant dense<0.000000e+00> : vector<16x32xf32>
    %153 = tpu.matmul %151, %152, %cst_53 {dimension_numbers = #tpu.dot_dimension_numbers<[1], [0], [0], [1], [0, 0, 1, 1], [], []>} : vector<16x8xf32>, vector<8x32xf32>, vector<16x32xf32> -> vector<16x32xf32>
    %154 = arith.addf %131, %153 : vector<16x32xf32>
    %155 = vector.broadcast %9 : vector<1x32xf32> to vector<16x32xf32>
    %156 = arith.addf %154, %155 : vector<16x32xf32>
    %157 = arith.addf %40, %156 : vector<16x32xf32>
    %cst_54 = arith.constant dense<0.000000e+00> : vector<16xf32>
    %158 = vector.multi_reduction <add>, %157, %cst_54 [1] : vector<16x32xf32> to vector<16xf32>
    %159 = vector.shape_cast %158 : vector<16xf32> to vector<16x1xf32>
    %cst_55 = arith.constant 3.200000e+01 : f32
    %160 = vector.broadcast %cst_55 : f32 to vector<16x1xf32>
    %161 = arith.divf %159, %160 : vector<16x1xf32>
    %162 = vector.broadcast %161 : vector<16x1xf32> to vector<16x32xf32>
    %163 = arith.subf %157, %162 : vector<16x32xf32>
    %164 = arith.mulf %163, %163 : vector<16x32xf32>
    %cst_56 = arith.constant dense<0.000000e+00> : vector<16xf32>
    %165 = vector.multi_reduction <add>, %164, %cst_56 [1] : vector<16x32xf32> to vector<16xf32>
    %166 = vector.shape_cast %165 : vector<16xf32> to vector<16x1xf32>
    %cst_57 = arith.constant 3.200000e+01 : f32
    %167 = vector.broadcast %cst_57 : f32 to vector<16x1xf32>
    %168 = arith.divf %166, %167 : vector<16x1xf32>
    %169 = vector.broadcast %161 : vector<16x1xf32> to vector<16x32xf32>
    %170 = arith.subf %157, %169 : vector<16x32xf32>
    %cst_58 = arith.constant 9.99999996E-13 : f32
    %171 = vector.broadcast %cst_58 : f32 to vector<16x1xf32>
    %172 = arith.addf %168, %171 : vector<16x1xf32>
    %173 = math.rsqrt %172 : vector<16x1xf32>
    %174 = vector.broadcast %173 : vector<16x1xf32> to vector<16x32xf32>
    %175 = arith.mulf %170, %174 : vector<16x32xf32>
    %176 = vector.broadcast %10 : vector<1x32xf32> to vector<16x32xf32>
    %177 = arith.mulf %175, %176 : vector<16x32xf32>
    %178 = vector.broadcast %11 : vector<1x32xf32> to vector<16x32xf32>
    %179 = arith.addf %177, %178 : vector<16x32xf32>
    %cst_59 = arith.constant dense<0.000000e+00> : vector<16x128xf32>
    %180 = tpu.matmul %179, %1, %cst_59 {dimension_numbers = #tpu.dot_dimension_numbers<[1], [0], [0], [1], [0, 0, 1, 1], [], []>} : vector<16x32xf32>, vector<32x128xf32>, vector<16x128xf32> -> vector<16x128xf32>
    %181 = vector.broadcast %12 : vector<1x128xf32> to vector<16x128xf32>
    %182 = arith.addf %180, %181 : vector<16x128xf32>
    %183 = arith.mulf %182, %182 : vector<16x128xf32>
    %184 = arith.mulf %182, %183 : vector<16x128xf32>
    %cst_60 = arith.constant 4.471500e-02 : f32
    %185 = vector.broadcast %cst_60 : f32 to vector<16x128xf32>
    %186 = arith.mulf %185, %184 : vector<16x128xf32>
    %187 = arith.addf %182, %186 : vector<16x128xf32>
    %cst_61 = arith.constant 0.797884583 : f32
    %188 = vector.broadcast %cst_61 : f32 to vector<16x128xf32>
    %189 = arith.mulf %188, %187 : vector<16x128xf32>
    %190 = math.tanh %189 : vector<16x128xf32>
    %cst_62 = arith.constant 1.000000e+00 : f32
    %191 = vector.broadcast %cst_62 : f32 to vector<16x128xf32>
    %192 = arith.addf %191, %190 : vector<16x128xf32>
    %cst_63 = arith.constant 5.000000e-01 : f32
    %193 = vector.broadcast %cst_63 : f32 to vector<16x128xf32>
    %194 = arith.mulf %193, %192 : vector<16x128xf32>
    %195 = arith.mulf %182, %194 : vector<16x128xf32>
    %cst_64 = arith.constant dense<0.000000e+00> : vector<16x32xf32>
    %196 = tpu.matmul %195, %2, %cst_64 {dimension_numbers = #tpu.dot_dimension_numbers<[1], [0], [0], [1], [0, 0, 1, 1], [], []>} : vector<16x128xf32>, vector<128x32xf32>, vector<16x32xf32> -> vector<16x32xf32>
    %197 = vector.broadcast %13 : vector<1x32xf32> to vector<16x32xf32>
    %198 = arith.addf %196, %197 : vector<16x32xf32>
    %199 = arith.addf %179, %198 : vector<16x32xf32>
    %cst_65 = arith.constant dense<0.000000e+00> : vector<16xf32>
    %200 = vector.multi_reduction <add>, %199, %cst_65 [1] : vector<16x32xf32> to vector<16xf32>
    %201 = vector.shape_cast %200 : vector<16xf32> to vector<16x1xf32>
    %cst_66 = arith.constant 3.200000e+01 : f32
    %202 = vector.broadcast %cst_66 : f32 to vector<16x1xf32>
    %203 = arith.divf %201, %202 : vector<16x1xf32>
    %204 = vector.broadcast %203 : vector<16x1xf32> to vector<16x32xf32>
    %205 = arith.subf %199, %204 : vector<16x32xf32>
    %206 = arith.mulf %205, %205 : vector<16x32xf32>
    %cst_67 = arith.constant dense<0.000000e+00> : vector<16xf32>
    %207 = vector.multi_reduction <add>, %206, %cst_67 [1] : vector<16x32xf32> to vector<16xf32>
    %208 = vector.shape_cast %207 : vector<16xf32> to vector<16x1xf32>
    %cst_68 = arith.constant 3.200000e+01 : f32
    %209 = vector.broadcast %cst_68 : f32 to vector<16x1xf32>
    %210 = arith.divf %208, %209 : vector<16x1xf32>
    %211 = vector.broadcast %203 : vector<16x1xf32> to vector<16x32xf32>
    %212 = arith.subf %199, %211 : vector<16x32xf32>
    %cst_69 = arith.constant 9.99999996E-13 : f32
    %213 = vector.broadcast %cst_69 : f32 to vector<16x1xf32>
    %214 = arith.addf %210, %213 : vector<16x1xf32>
    %215 = math.rsqrt %214 : vector<16x1xf32>
    %216 = vector.broadcast %215 : vector<16x1xf32> to vector<16x32xf32>
    %217 = arith.mulf %212, %216 : vector<16x32xf32>
    %218 = vector.broadcast %14 : vector<1x32xf32> to vector<16x32xf32>
    %219 = arith.mulf %217, %218 : vector<16x32xf32>
    %220 = vector.broadcast %15 : vector<1x32xf32> to vector<16x32xf32>
    %221 = arith.addf %219, %220 : vector<16x32xf32>
    %222 = vector.shape_cast %221 : vector<16x32xf32> to vector<2x8x32xf32>
    %223 = vector.extract_strided_slice %222 {offsets = [0, 0, 0], sizes = [2, 1, 32], strides = [1, 1, 1]} : vector<2x8x32xf32> to vector<2x1x32xf32>
    %224 = vector.shape_cast %223 : vector<2x1x32xf32> to vector<2x32xf32>
    %cst_70 = arith.constant dense<0.000000e+00> : vector<2x32xf32>
    %225 = tpu.matmul %224, %4, %cst_70 {dimension_numbers = #tpu.dot_dimension_numbers<[1], [0], [0], [1], [0, 0, 1, 1], [], []>} : vector<2x32xf32>, vector<32x32xf32>, vector<2x32xf32> -> vector<2x32xf32>
    %226 = vector.broadcast %16 : vector<1x32xf32> to vector<2x32xf32>
    %227 = arith.addf %225, %226 : vector<2x32xf32>
    %228 = math.tanh %227 : vector<2x32xf32>
    %cst_71 = arith.constant dense<0.000000e+00> : vector<2x128xf32>
    %229 = tpu.matmul %228, %5, %cst_71 {dimension_numbers = #tpu.dot_dimension_numbers<[1], [0], [0], [1], [0, 0, 1, 1], [], []>} : vector<2x32xf32>, vector<32x128xf32>, vector<2x128xf32> -> vector<2x128xf32>
    %230 = vector.broadcast %17 : vector<1x128xf32> to vector<2x128xf32>
    %231 = arith.addf %229, %230 : vector<2x128xf32>
    %c0_72 = arith.constant 0 : index
    %c0_73 = arith.constant 0 : index
    %232 = vector.load %arg4[%c0_72, %c0_73] : memref<2x128xf32, #tpu.memory_space<vmem>>, vector<2x128xf32>
    tpu.vector_store %arg4[%c0_72, %c0_73], %231 {strides = array<i32>} : memref<2x128xf32, #tpu.memory_space<vmem>>, vector<2x128xf32>,
    return
  }
  func.func @transform_0(%arg0: i32, %arg1: memref<2xi32, #tpu.memory_space<smem>>) -> (i32, i32) {
    %c0_i32 = arith.constant 0 : i32
    %c0_i32_0 = arith.constant 0 : i32
    %c0_i32_1 = arith.constant 0 : i32
    return %c0_i32, %c0_i32_0 : i32, i32
  }
  func.func @transform_1(%arg0: i32, %arg1: memref<2xi32, #tpu.memory_space<smem>>) -> (i32, i32) {
    %c0_i32 = arith.constant 0 : i32
    %c0_i32_0 = arith.constant 0 : i32
    %c0_i32_1 = arith.constant 0 : i32
    return %c0_i32, %c0_i32_0 : i32, i32
  }
  func.func @transform_2(%arg0: i32, %arg1: memref<2xi32, #tpu.memory_space<smem>>) -> (i32, i32) {
    %c0_i32 = arith.constant 0 : i32
    %c0_i32_0 = arith.constant 0 : i32
    %c0_i32_1 = arith.constant 0 : i32
    return %c0_i32, %c0_i32_0 : i32, i32
  }
}

</mosaic_0001>

<bundles_post_ra>
// kernel: ebert_classifier.1
= control target key start
LH: loop header
LB: loop body
LE: loop exit
PB: predicated region body
PF: predicated region fallthrough
CT: control target
= control target key end

     0   :  { %s3184_s0 = inlined_call_operand.vmem [shape: s32[2], index: 0, kind: input, shape index: {}]   ;;  %s3185_s1 = inlined_call_operand.vmem [shape: f32[16,32], index: 1, kind: input, shape index: {}]   ;;  %s3186_s2 = inlined_call_operand.vmem [shape: f32[304,128], index: 2, kind: input, shape index: {}]   ;;  %s3187_s3 = inlined_call_operand.hbm [shape: f32[2,128], index: 3, kind: output, shape index: {}]  }
   0x1   :  { %s8_s14 = sshll.u32 %s3184_s0, 4  ;;  %s9_s14 = int_to_ptr.vmem [resolvable:$true] %s8_s14 }
   0x2   :  { %s2756_s15 = scalar_lea.vmem %s9_s14, 16  ;;  %p2761_p1 = scmp.lt.s32.totalorder %s9_s14, %s9_s14 }
   0x3   :  { %p2757_p0 = scmp.ne.s32.totalorder %s9_s14, %s2756_s15  ;;  %p2762_p2 = scmp.lt.s32.totalorder %s2756_s15, %s2756_s15 }
   0x5   :  { %p2763_p3 = por %p2762_p2, %p2761_p1 }
   0x7   :  { %p2764_p4 = pnand %p2763_p3, %p2757_p0 }
   0x9   :  { %2767 = shalt.err (!%p2764_p4)  }
   0xa   :  { %s2794_s16 = smov [#allocation3]  }
   0xb   :  { %11 = dma.vmem_to_smem %s9_s14, 16, %s2794_s16, [#allocation2] }
   0xc   :  { %2790 = dma.done.wait [#allocation2], 16 }
   0xd   :  { %2791 = vsyncadd [#allocation2], 4294967280 }
   0xe   :  { %13 = sfence }
   0xf   :  { %v67_v0 = vld [vmem:[%s3185_s1] sm:$0xff]  ;;  %vm69_vm0 = vcmask 261120   ;;  %v68_v1 = vld [vmem:[%s3185_s1 + $0x8] sm:$0xff] }
  0x10   :  { %14 = vsyncpa [#allocation5], 0  ;;  %v70_v2 = vsel %vm69_vm0, %v67_v0, 0.0  ;;  %v73_v3 = vsel %vm69_vm0, %v68_v1, 0.0  ;;  %v19_v14 = vld [vmem:[%s3186_s2] sm:$0xff]  ;;  %v20_v15 = vld [vmem:[%s3186_s2 + $0x8] sm:$0xff]  ;;  %v194_v44 = vlaneseq }
  0x11   :  { %71 = vadd.xlane.f32.xlu0 %v70_v2  ;;  %v21_v16 = vld [vmem:[%s3186_s2 + $0x10] sm:$0xff]  ;;  %v2623_v17 = vpack.c.bf16 %v20_v15, %v19_v14  ;;  %v22_v18 = vld [vmem:[%s3186_s2 + $0x18] sm:$0xff]  ;;  %v2309_v27 = vld [vmem:[%s3186_s2 + $0x120] ss:$0 sm:$0xff]  ;;  %v2795_v36 = vmov 0.0   ;;  %vm2796_vm1 = vmmov 0  }
  0x12   :  { %v2627_v19 = vpack.c.bf16 %v22_v18, %v21_v16  ;;  %v2310_v29 = vld [vmem:[%s3186_s2 + $0x121] ss:$0 sm:$0xff]  ;;  %2465 = vmatprep.subr.mxu0 %v2795_v36  ;;  %2467 = vmatprep.mubr.msk.f32.mxu0 %vm2796_vm1, %v2795_v36  ;;  %v2311_v37 = vld [vmem:[%s3186_s2 + $0x122] ss:$0 sm:$0xff]  ;;  %s2797_s6 = smov 96   ;;  %vm207_vm2 = vcmask 64512  }
  0x13   :  { %2624 = vmatprep.subr.bf16.mxu1 %v2623_v17  ;;  %s2314_s7 = sld [smem:[#allocation3 + $0x1]]  ;;  %v195_v46 = vand.u32 127, %v194_v44  ;;  %v2798_v50 = vmov -1e+09   ;;  %s2799_s8 = smov 88   ;;  %vm2142_vm5 = vcmask 1041409  }
  0x14   :  { %2626 = vmatpush3.bf16.msra.mxu1 %v2623_v17  ;;  %s2800_s9 = smov 120   ;;  %s196_s10 = sld [smem:[#allocation3]] }
  0x15   :  { %74 = vadd.xlane.f32.xlu0 %v73_v3  ;;  %2628 = vmatprep.subr.bf16.mxu1 %v2627_v19  ;;  %s2801_s11 = smov 80   ;;  %s2802_s12 = smov 64  }
  0x16   :  { %s2803_s13 = smov 56   ;;  %s2804_s14 = smov 112  }
  0x17   :  { %s2805_s15 = smov 48   ;;  %s2806_s16 = smov 72  }
  0x18   :  { %2630 = vmatpush3.bf16.msra.mxu1 %v2627_v19  ;;  %s2807_s17 = smov 104   ;;  %s2808_s22 = smov 40  }
  0x19   :  { %2455 = vmatprep.subr.mxu1 %v2795_v36  ;;  %v199_v45 = vstv %s2314_s7 }
  0x1a   :  { %vm201_vm3 = vcmp.lt.s32.totalorder %v195_v46, %v199_v45  ;;  %v197_v56 = vstv %s196_s10 }
  0x1b   :  { %v2897_v51 = vsel %vm201_vm3, 0.0, %v2798_v50  ;;  %vm200_vm4 = vcmp.lt.s32.totalorder %v195_v46, %v197_v56 }
  0x1c   :  { %v2903_v58 = vsel %vm200_vm4, 0.0, %v2798_v50 }
  0x9e   :  { %v72_v4 = vpop.xlane.xlu0 %71 }
  0x9f   :  { %v77_v5 = vmul.f32 0.03125, %v72_v4 }
  0xa1   :  { %v79_v6 = vsub.f32 %v67_v0, %v77_v5 }
  0xa2   :  { %v75_v7 = vpop.xlane.xlu0 %74 }
  0xa3   :  { %v78_v8 = vmul.f32 0.03125, %v75_v7  ;;  %v81_v9 = vmul.f32 %v79_v6, %v79_v6 }
  0xa5   :  { %v80_v10 = vsub.f32 %v68_v1, %v78_v8  ;;  %v83_v11 = vsel %vm69_vm0, %v81_v9, 0.0 }
  0xa6   :  { %84 = vadd.xlane.f32.xlu1 %v83_v11 }
  0xa7   :  { %v82_v12 = vmul.f32 %v80_v10, %v80_v10 }
  0xa9   :  { %v86_v13 = vsel %vm69_vm0, %v82_v12, 0.0 }
  0xaa   :  { %87 = vadd.xlane.f32.xlu1 %v86_v13 }
 0x133   :  { %v85_v20 = vpop.xlane.xlu1 %84 }
 0x134   :  { %v89_v21 = vmul.f32 0.03125, %v85_v20 }
 0x136   :  { %v91_v22 = vadd.f32 1e-12, %v89_v21 }
 0x137   :  { %v88_v23 = vpop.xlane.xlu1 %87 }
 0x138   :  { %2706 = vrsqrt.f32 %v91_v22  ;;  %v90_v24 = vmul.f32 0.03125, %v88_v23 }
 0x13a   :  { %v92_v25 = vadd.f32 1e-12, %v90_v24 }
 0x13c   :  { %2708 = vrsqrt.f32 %v92_v25 }
 0x142   :  { %v2707_v26 = vpop.eup %2706 }
 0x143   :  { %v95_v28 = vmul.f32 %v2707_v26, %v79_v6 }
 0x145   :  { %v101_v30 = vmul.f32 %v2309_v27, %v95_v28 }
 0x146   :  { %v2709_v31 = vpop.eup %2708 }
 0x147   :  { %v96_v32 = vmul.f32 %v2709_v31, %v80_v10  ;;  %v2862_v33 = vadd.f32 %v2310_v29, %v101_v30 }
 0x149   :  { %v102_v34 = vmul.f32 %v2309_v27, %v96_v32  ;;  %2452 = vmatprep.mubr.msk.f32.mxu1 %vm69_vm0, %v2862_v33 }
 0x14b   :  { %v2866_v35 = vadd.f32 %v2310_v29, %v102_v34 }
 0x14d   :  { %2453 = vmatmul.mubr.msk.f32.vlgmr.msra.gmra.mrb[0].mxu1 %vm69_vm0, %v2866_v35 }
 0x14e   :  { %2457 = vmatprep.mubr.msk.f32.mxu1 %vm2796_vm1, %v2795_v36 }
 0x220   :  { %v2454_v38 = vpop.f32.mrb[0].mxu1 }
 0x221   :  { %v2879_v39 = vadd.f32 %v2454_v38, %v2311_v37  ;;  %v185_v40 = vpop.f32.mrb[1].mxu1 }
 0x222   :  { %v2881_v41 = vadd.f32 %v2311_v37, %v185_v40 }
 0x223   :  { %283 = vrot.lane.b32.xlu1 %v2879_v39, %s2797_s6 }
 0x224   :  { %205 = vrot.lane.b32.xlu0 %v2881_v41, %s2797_s6 }
 0x295   :  { %v284_v43 = vpop.permute.xlu1 %283 }
 0x296   :  { %v206_v42 = vpop.permute.xlu0 %205 }
 0x297   :  { %2456 = vmatpush3.xpose.msk.msra.mxu1 %vm207_vm2, %v206_v42 }
 0x298   :  { %2460 = vmatprep.subr.mxu1 %v2795_v36 }
 0x29a   :  { %2458 = vmatmul.mubr.msk.f32.vlgmr.msra.gmra.mrb[2].mxu1 %vm207_vm2, %v2881_v41 }
 0x29b   :  { %2461 = vmatpush3.xpose.msk.msra.mxu1 %vm207_vm2, %v284_v43  ;;  %2462 = vmatprep.mubr.msk.f32.mxu1 %vm2796_vm1, %v2795_v36 }
 0x29c   :  { %2470 = vmatprep.subr.mxu1 %v2795_v36 }
 0x29e   :  { %2463 = vmatmul.mubr.msk.f32.vlgmr.msra.gmra.mrb[4].mxu1 %vm207_vm2, %v2879_v39 }
 0x29f   :  { %2472 = vmatprep.mubr.msk.f32.mxu1 %vm2796_vm1, %v2795_v36 }
 0x36d   :  { %v278_v47 = vpop.f32.mrb[2].mxu1 }
 0x36e   :  { %v2459_v48 = vpop.f32.mrb[3].mxu1  ;;  %v359_v57 = vmul.f32 0.35355338, %v278_v47 }
 0x370   :  { %v361_v59 = vadd.f32 %v359_v57, %v2903_v58 }
 0x371   :  { %v355_v49 = vpop.f32.mrb[4].mxu1 }
 0x372   :  { %v360_v52 = vmul.f32 0.35355338, %v355_v49  ;;  %v2464_v53 = vpop.f32.mrb[5].mxu1  ;;  %v363_v60 = vsel %vm207_vm2, %v361_v59, -inf }
 0x374   :  { %v362_v54 = vadd.f32 %v360_v52, %v2897_v51 }
 0x376   :  { %v366_v55 = vsel %vm207_vm2, %v362_v54, -inf }
 0x377   :  { %367 = vmax.xlane.f32.xlu1 %v366_v55 }
 0x388   :  { %617 = vrot.lane.b32.xlu1 %v2879_v39, %s2799_s8 }
 0x38c   :  { %615 = vrot.lane.b32.xlu1 %v2879_v39, %s2800_s9 }
 0x3b0   :  { %364 = vmax.xlane.f32.xlu1 %v363_v60 }
 0x3c1   :  { %539 = vrot.lane.b32.xlu1 %v2881_v41, %s2799_s8 }
 0x3c5   :  { %537 = vrot.lane.b32.xlu1 %v2881_v41, %s2800_s9 }
 0x3c9   :  { %1035 = vrot.lane.b32.xlu1 %v2881_v41, %s2801_s11 }
 0x404   :  { %v368_v61 = vpop.xlane.xlu1 %367 }
 0x405   :  { %v370_v62 = vsub.f32 %v362_v54, %v368_v61 }
 0x407   :  { %v373_v63 = vmul.f32 1.442695, %v370_v62 }
 0x408   :  { %v618_v2 = vpop.permute.xlu1 %617 }
 0x409   :  { %2710 = vpow2.f32 %v373_v63 }
 0x40c   :  { %v616_v3 = vpop.permute.xlu1 %615 }
 0x413   :  { %v2711_v0 = vpop.eup %2710 }
 0x414   :  { %v378_v1 = vsel %vm207_vm2, %v2711_v0, 0.0 }
 0x415   :  { %379 = vadd.xlane.f32.xlu0 %v378_v1 }
 0x42b   :  { %461 = vrot.lane.b32.xlu0 %v2879_v39, %s2802_s12 }
 0x43d   :  { %v365_v4 = vpop.xlane.xlu1 %364 }
 0x43e   :  { %v369_v5 = vsub.f32 %v361_v59, %v365_v4 }
 0x440   :  { %v371_v6 = vmul.f32 1.442695, %v369_v5 }
 0x441   :  { %v540_v16 = vpop.permute.xlu1 %539 }
 0x442   :  { %2712 = vpow2.f32 %v371_v6 }
 0x445   :  { %v538_v18 = vpop.permute.xlu1 %537 }
 0x449   :  { %v1036_v44 = vpop.permute.xlu1 %1035 }
 0x44c   :  { %v2713_v7 = vpop.eup %2712 }
 0x44d   :  { %v375_v8 = vsel %vm207_vm2, %v2713_v7, 0.0 }
 0x44e   :  { %376 = vadd.xlane.f32.xlu0 %v375_v8 }
 0x464   :  { %385 = vrot.lane.b32.xlu0 %v2881_v41, %s2802_s12 }
 0x4a2   :  { %v380_v9 = vpop.xlane.xlu0 %379 }
 0x4a3   :  { %2714 = vrcp.f32 %v380_v9 }
 0x4a6   :  { %v462_v10 = vpop.permute.xlu0 %461 }
 0x4a7   :  { %2471 = vmatpush3.msra.mxu1 %v462_v10 }
 0x4a8   :  { %2480 = vmatprep.subr.mxu1 %v2795_v36 }
 0x4ad   :  { %v2715_v11 = vpop.eup %2714 }
 0x4ae   :  { %v384_v12 = vmul.f32 %v2715_v11, %v2711_v0  ;;  %v44_v11 = vld [vmem:[%s3186_s2 + $0xc8] sm:$0xff] }
 0x4b0   :  { %2473 = vmatmul.mubr.msk.f32.vlgmr.msra.gmra.mrb[6].mxu1 %vm207_vm2, %v384_v12  ;;  %v43_v12 = vld [vmem:[%s3186_s2 + $0xc0] sm:$0xff] }
 0x4b1   :  { %2481 = vmatpush3.xpose.msk.msra.mxu1 %vm207_vm2, %v618_v2  ;;  %2482 = vmatprep.mubr.msk.f32.mxu1 %vm2796_vm1, %v2795_v36 }
 0x4b2   :  { %2490 = vmatprep.subr.mxu1 %v2795_v36 }
 0x4b4   :  { %2483 = vmatmul.mubr.msk.f32.vlgmr.msra.gmra.mrb[8].mxu1 %vm207_vm2, %v616_v3 }
 0x4b5   :  { %2492 = vmatprep.mubr.msk.f32.mxu1 %vm2796_vm1, %v2795_v36 }
 0x4db   :  { %v377_v13 = vpop.xlane.xlu0 %376 }
 0x4dc   :  { %2716 = vrcp.f32 %v377_v13 }
 0x4df   :  { %v386_v14 = vpop.permute.xlu0 %385 }
 0x4e0   :  { %2466 = vmatpush3.msra.mxu0 %v386_v14 }
 0x4e1   :  { %2475 = vmatprep.subr.mxu0 %v2795_v36 }
 0x4e6   :  { %v2717_v15 = vpop.eup %2716 }
 0x4e7   :  { %v383_v17 = vmul.f32 %v2717_v15, %v2713_v7 }
 0x4e9   :  { %2468 = vmatmul.mubr.msk.f32.vlgmr.msra.gmra.mrb[0].mxu0 %vm207_vm2, %v383_v17 }
 0x4ea   :  { %2476 = vmatpush3.xpose.msk.msra.mxu0 %vm207_vm2, %v540_v16  ;;  %2477 = vmatprep.mubr.msk.f32.mxu0 %vm2796_vm1, %v2795_v36 }
 0x4eb   :  { %2485 = vmatprep.subr.mxu0 %v2795_v36 }
 0x4ed   :  { %2478 = vmatmul.mubr.msk.f32.vlgmr.msra.gmra.mrb[2].mxu0 %vm207_vm2, %v538_v18 }
 0x4ee   :  { %2487 = vmatprep.mubr.msk.f32.mxu0 %vm2796_vm1, %v2795_v36 }
 0x583   :  { %v2933_v19 = vpop.f32.mrb[6].mxu1 }
 0x584   :  { %v2474_v20 = vpop.f32.mrb[7].mxu1 }
 0x587   :  { %v689_v21 = vpop.f32.mrb[8].mxu1 }
 0x588   :  { %v694_v22 = vmul.f32 0.35355338, %v689_v21  ;;  %v2484_v23 = vpop.f32.mrb[9].mxu1 }
 0x58a   :  { %v696_v24 = vadd.f32 %v694_v22, %v2897_v51 }
 0x58c   :  { %v700_v25 = vsel %vm207_vm2, %v696_v24, -inf }
 0x58d   :  { %701 = vmax.xlane.f32.xlu0 %v700_v25 }
 0x5a3   :  { %795 = vrot.lane.b32.xlu0 %v2879_v39, %s2803_s13 }
 0x5a7   :  { %1033 = vrot.lane.b32.xlu0 %v2881_v41, %s2804_s14 }
 0x5ab   :  { %1111 = vrot.lane.b32.xlu0 %v2879_v39, %s2804_s14  ;;  %s2810_s14 = smov [#allocation4]  }
 0x5bc   :  { %v2941_v26 = vpop.f32.mrb[0].mxu0 }
 0x5bd   :  { %v2469_v27 = vpop.f32.mrb[1].mxu0 }
 0x5c0   :  { %v611_v28 = vpop.f32.mrb[2].mxu0 }
 0x5c1   :  { %v2479_v29 = vpop.f32.mrb[3].mxu0  ;;  %v693_v40 = vmul.f32 0.35355338, %v611_v28 }
 0x5c2   :  { %v45_v29 = vld [vmem:[%s3186_s2 + $0xd0] sm:$0xff] }
 0x5c3   :  { %v695_v42 = vadd.f32 %v693_v40, %v2903_v58 }
 0x5c5   :  { %v697_v43 = vsel %vm207_vm2, %v695_v42, -inf }
 0x61a   :  { %v702_v30 = vpop.xlane.xlu0 %701 }
 0x61b   :  { %v704_v31 = vsub.f32 %v696_v24, %v702_v30 }
 0x61d   :  { %v707_v32 = vmul.f32 1.442695, %v704_v31 }
 0x61e   :  { %v796_v34 = vpop.permute.xlu0 %795 }
 0x61f   :  { %2718 = vpow2.f32 %v707_v32  ;;  %2491 = vmatpush3.msra.mxu1 %v796_v34 }
 0x620   :  { %2505 = vmatprep.subr.mxu1 %v2795_v36 }
 0x622   :  { %v1034_v48 = vpop.permute.xlu0 %1033 }
 0x626   :  { %v1112_v50 = vpop.permute.xlu0 %1111 }
 0x629   :  { %v2719_v37 = vpop.eup %2718 }
 0x62a   :  { %v712_v38 = vsel %vm207_vm2, %v2719_v37, 0.0 }
 0x62b   :  { %713 = vadd.xlane.f32.xlu1 %v712_v38 }
 0x63c   :  { %1113 = vrot.lane.b32.xlu1 %v2879_v39, %s2801_s11 }
 0x660   :  { %698 = vmax.xlane.f32.xlu1 %v697_v43 }
 0x6b8   :  { %v714_v45 = vpop.xlane.xlu1 %713 }
 0x6b9   :  { %2720 = vrcp.f32 %v714_v45 }
 0x6bc   :  { %v1114_v49 = vpop.permute.xlu1 %1113 }
 0x6c3   :  { %v2721_v46 = vpop.eup %2720 }
 0x6c4   :  { %v718_v47 = vmul.f32 %v2721_v46, %v2719_v37 }
 0x6c6   :  { %2493 = vmatmul.mubr.msk.f32.vlgmr.msra.gmra.mrb[10].mxu1 %vm207_vm2, %v718_v47 }
 0x6c7   :  { %2506 = vmatpush3.xpose.msk.msra.mxu1 %vm207_vm2, %v1036_v44  ;;  %2507 = vmatprep.mubr.msk.f32.mxu1 %vm2796_vm1, %v2795_v36 }
 0x6c8   :  { %2510 = vmatprep.subr.mxu1 %v2795_v36 }
 0x6ca   :  { %2508 = vmatmul.mubr.msk.f32.vlgmr.msra.gmra.mrb[12].mxu1 %vm207_vm2, %v1034_v48 }
 0x6cb   :  { %2511 = vmatpush3.xpose.msk.msra.mxu1 %vm207_vm2, %v1114_v49  ;;  %2512 = vmatprep.mubr.msk.f32.mxu1 %vm2796_vm1, %v2795_v36 }
 0x6cc   :  { %2520 = vmatprep.subr.mxu1 %v2795_v36 }
 0x6ce   :  { %2513 = vmatmul.mubr.msk.f32.vlgmr.msra.gmra.mrb[14].mxu1 %vm207_vm2, %v1112_v50 }
 0x6cf   :  { %2522 = vmatprep.mubr.msk.f32.mxu1 %vm2796_vm1, %v2795_v36 }
 0x6ed   :  { %v699_v52 = vpop.xlane.xlu1 %698 }
 0x6ee   :  { %v703_v53 = vsub.f32 %v695_v42, %v699_v52 }
 0x6f0   :  { %v705_v54 = vmul.f32 1.442695, %v703_v53 }
 0x6f2   :  { %2722 = vpow2.f32 %v705_v54 }
 0x6fc   :  { %v2723_v55 = vpop.eup %2722 }
 0x6fd   :  { %v709_v56 = vsel %vm207_vm2, %v2723_v55, 0.0 }
 0x6fe   :  { %710 = vadd.xlane.f32.xlu0 %v709_v56 }
 0x714   :  { %719 = vrot.lane.b32.xlu0 %v2881_v41, %s2803_s13 }
 0x718   :  { %1291 = vrot.lane.b32.xlu0 %v2879_v39, %s2805_s15 }
 0x71c   :  { %1452 = vrot.lane.b32.xlu0 %v2881_v41, %s2806_s16 }
 0x720   :  { %1530 = vrot.lane.b32.xlu0 %v2879_v39, %s2806_s16 }
 0x724   :  { %1450 = vrot.lane.b32.xlu0 %v2881_v41, %s2807_s17 }
 0x78b   :  { %v711_v57 = vpop.xlane.xlu0 %710 }
 0x78c   :  { %2724 = vrcp.f32 %v711_v57 }
 0x78f   :  { %v720_v59 = vpop.permute.xlu0 %719 }
 0x790   :  { %2486 = vmatpush3.msra.mxu0 %v720_v59 }
 0x791   :  { %2495 = vmatprep.subr.mxu0 %v44_v11 }
 0x793   :  { %v1292_v60 = vpop.permute.xlu0 %1291 }
 0x794   :  { %2521 = vmatpush3.msra.mxu1 %v1292_v60 }
 0x795   :  { %2530 = vmatprep.subr.mxu1 %v2795_v36 }
 0x796   :  { %v2725_v61 = vpop.eup %2724 }
 0x797   :  { %v717_v62 = vmul.f32 %v2725_v61, %v2723_v55  ;;  %v1453_v31 = vpop.permute.xlu0 %1452 }
 0x799   :  { %2488 = vmatmul.mubr.msk.f32.vlgmr.msra.gmra.mrb[4].mxu0 %vm207_vm2, %v717_v62  ;;  %v867_v63 = vpop.f32.mrb[10].mxu1 }
 0x79a   :  { %v2494_v0 = vpop.f32.mrb[11].mxu1  ;;  %2496 = vmatpush3.msra.mxu0 %v44_v11 }
 0x79b   :  { %2500 = vmatprep.subr.mxu0 %v43_v12  ;;  %v1531_v34 = vpop.permute.xlu0 %1530 }
 0x79d   :  { %v1107_v1 = vpop.f32.mrb[12].mxu1 }
 0x79e   :  { %v1189_v2 = vmul.f32 0.35355338, %v1107_v1  ;;  %v2509_v3 = vpop.f32.mrb[13].mxu1 }
 0x79f   :  { %v1451_v38 = vpop.permute.xlu0 %1450 }
 0x7a0   :  { %v1191_v4 = vadd.f32 %v1189_v2, %v2903_v58 }
 0x7a1   :  { %v1185_v5 = vpop.f32.mrb[14].mxu1 }
 0x7a2   :  { %v1190_v6 = vmul.f32 0.35355338, %v1185_v5  ;;  %v2514_v7 = vpop.f32.mrb[15].mxu1  ;;  %v1193_v8 = vsel %vm207_vm2, %v1191_v4, -inf }
 0x7a3   :  { %1194 = vmax.xlane.f32.xlu1 %v1193_v8 }
 0x7a4   :  { %v1192_v9 = vadd.f32 %v1190_v6, %v2897_v51 }
 0x7a6   :  { %v1196_v10 = vsel %vm207_vm2, %v1192_v9, -inf }
 0x7a7   :  { %1197 = vmax.xlane.f32.xlu1 %v1196_v10 }
 0x830   :  { %v1195_v13 = vpop.xlane.xlu1 %1194 }
 0x831   :  { %v1199_v14 = vsub.f32 %v1191_v4, %v1195_v13  ;;  %v2347_v13 = vld [vmem:[%s3186_s2 + $0x123] ss:$0 sm:$0xff] }
 0x833   :  { %v1201_v15 = vmul.f32 1.442695, %v1199_v14 }
 0x834   :  { %v1198_v16 = vpop.xlane.xlu1 %1197 }
 0x835   :  { %2726 = vpow2.f32 %v1201_v15  ;;  %v1200_v17 = vsub.f32 %v1192_v9, %v1198_v16  ;;  %v46_v9 = vld [vmem:[%s3186_s2 + $0xd8] sm:$0xff] }
 0x837   :  { %v1203_v18 = vmul.f32 1.442695, %v1200_v17 }
 0x839   :  { %2728 = vpow2.f32 %v1203_v18 }
 0x83f   :  { %v2727_v20 = vpop.eup %2726 }
 0x840   :  { %v1205_v21 = vsel %vm207_vm2, %v2727_v20, 0.0 }
 0x841   :  { %1206 = vadd.xlane.f32.xlu1 %v1205_v21 }
 0x843   :  { %v2729_v22 = vpop.eup %2728 }
 0x844   :  { %v1208_v23 = vsel %vm207_vm2, %v2729_v22, 0.0 }
 0x845   :  { %1209 = vadd.xlane.f32.xlu1 %v1208_v23 }
 0x856   :  { %1215 = vrot.lane.b32.xlu1 %v2881_v41, %s2805_s15  ;;  %s2301_s15 = sshll.u32 %s2810_s14, 4  ;;  %s2302_s15 = int_to_ptr.vmem [resolvable:$true] %s2301_s15 }
 0x857   :  { %s2768_s16 = scalar_lea.vmem %s2302_s15, 32  ;;  %p2773_p6 = scmp.lt.s32.totalorder %s2302_s15, %s2302_s15 }
 0x858   :  { %p2769_p5 = scmp.ne.s32.totalorder %s2302_s15, %s2768_s16  ;;  %p2774_p7 = scmp.lt.s32.totalorder %s2768_s16, %s2768_s16 }
 0x85a   :  { %1528 = vrot.lane.b32.xlu1 %v2879_v39, %s2807_s17  ;;  %p2775_p8 = por %p2774_p7, %p2773_p6 }
 0x85c   :  { %p2776_p9 = pnand %p2775_p8, %p2769_p5 }
 0x86c   :  { %v791_v24 = vpop.f32.mrb[4].mxu0 }
 0x86d   :  { %v2489_v25 = vpop.f32.mrb[5].mxu0  ;;  %2497 = vmatprep.mubr.msk.f32.mxu0 %vm207_vm2, %v791_v24 }
 0x86e   :  { %2498 = vmatmul.mubr.msk.f32.vlgmr.msra.gmra.mrb[6].mxu0 %vm207_vm2, %v867_v63 }
 0x86f   :  { %2502 = vmatprep.mubr.msk.f32.mxu0 %vm207_vm2, %v2941_v26  ;;  %2501 = vmatpush3.msra.mxu0 %v43_v12 }
 0x870   :  { %2515 = vmatprep.subr.mxu0 %v2795_v36 }
 0x876   :  { %2503 = vmatmul.mubr.msk.f32.vlgmr.msra.gmra.mrb[6].mxu0 %vm207_vm2, %v2933_v19 }
 0x877   :  { %2517 = vmatprep.mubr.msk.f32.mxu0 %vm2796_vm1, %v2795_v36 }
 0x8ce   :  { %v1207_v27 = vpop.xlane.xlu1 %1206 }
 0x8cf   :  { %2730 = vrcp.f32 %v1207_v27 }
 0x8d2   :  { %v1210_v28 = vpop.xlane.xlu1 %1209 }
 0x8d3   :  { %2732 = vrcp.f32 %v1210_v28 }
 0x8d6   :  { %v1216_v30 = vpop.permute.xlu1 %1215 }
 0x8d7   :  { %2516 = vmatpush3.msra.mxu0 %v1216_v30 }
 0x8d8   :  { %2525 = vmatprep.subr.mxu0 %v45_v29 }
 0x8d9   :  { %v2731_v26 = vpop.eup %2730 }
 0x8da   :  { %v1213_v32 = vmul.f32 %v2731_v26, %v2727_v20  ;;  %v1529_v45 = vpop.permute.xlu1 %1528 }
 0x8dc   :  { %2518 = vmatmul.mubr.msk.f32.vlgmr.msra.gmra.mrb[8].mxu0 %vm207_vm2, %v1213_v32  ;;  %v24_v32 = vld [vmem:[%s3186_s2 + $0x28] sm:$0xff] }
 0x8dd   :  { %v2733_v19 = vpop.eup %2732  ;;  %2526 = vmatpush3.msra.mxu0 %v45_v29 }
 0x8de   :  { %v1214_v37 = vmul.f32 %v2733_v19, %v2729_v22  ;;  %2535 = vmatprep.subr.mxu0 %v2795_v36 }
 0x8e0   :  { %2523 = vmatmul.mubr.msk.f32.vlgmr.msra.gmra.mrb[16].mxu1 %vm207_vm2, %v1214_v37  ;;  %v26_v37 = vld [vmem:[%s3186_s2 + $0x38] sm:$0xff] }
 0x8e1   :  { %2531 = vmatpush3.xpose.msk.msra.mxu1 %vm207_vm2, %v1453_v31  ;;  %2532 = vmatprep.mubr.msk.f32.mxu1 %vm2796_vm1, %v2795_v36 }
 0x8e2   :  { %2540 = vmatprep.subr.mxu1 %v2795_v36 }
 0x8e4   :  { %2533 = vmatmul.mubr.msk.f32.vlgmr.msra.gmra.mrb[18].mxu1 %vm207_vm2, %v1451_v38 }
 0x8e5   :  { %2542 = vmatprep.mubr.msk.f32.mxu1 %vm2796_vm1, %v2795_v36 }
 0x9af   :  { %v1287_v40 = vpop.f32.mrb[8].mxu0 }
 0x9b0   :  { %v2519_v42 = vpop.f32.mrb[9].mxu0  ;;  %2527 = vmatprep.mubr.msk.f32.mxu0 %vm207_vm2, %v1287_v40 }
 0x9b3   :  { %v1363_v43 = vpop.f32.mrb[16].mxu1 }
 0x9b4   :  { %v2524_v44 = vpop.f32.mrb[17].mxu1  ;;  %2528 = vmatmul.mubr.msk.f32.vlgmr.msra.gmra.mrb[6].mxu0 %vm207_vm2, %v1363_v43 }
 0x9b5   :  { %2536 = vmatpush3.xpose.msk.msra.mxu0 %vm207_vm2, %v1531_v34  ;;  %2537 = vmatprep.mubr.msk.f32.mxu0 %vm2796_vm1, %v2795_v36  ;;  %v25_v34 = vld [vmem:[%s3186_s2 + $0x30] sm:$0xff] }
 0x9b6   :  { %2545 = vmatprep.subr.mxu0 %v2795_v36  ;;  %v2635_v38 = vpack.c.bf16 %v26_v37, %v25_v34 }
 0x9b7   :  { %v1524_v46 = vpop.f32.mrb[18].mxu1 }
 0x9b8   :  { %v1606_v47 = vmul.f32 0.35355338, %v1524_v46  ;;  %v2534_v48 = vpop.f32.mrb[19].mxu1  ;;  %2538 = vmatmul.mubr.msk.f32.vlgmr.msra.gmra.mrb[10].mxu0 %vm207_vm2, %v1529_v45 }
 0x9b9   :  { %2547 = vmatprep.mubr.msk.f32.mxu0 %vm2796_vm1, %v2795_v36  ;;  %v2348_v48 = vld [vmem:[%s3186_s2 + $0x124] ss:$0 sm:$0xff] }
 0x9ba   :  { %v1608_v49 = vadd.f32 %v1606_v47, %v2903_v58 }
 0x9bc   :  { %v1610_v50 = vsel %vm207_vm2, %v1608_v49, -inf }
 0x9bd   :  { %1611 = vmax.xlane.f32.xlu0 %v1610_v50 }
 0xa4a   :  { %v1612_v52 = vpop.xlane.xlu0 %1611 }
 0xa4b   :  { %v1616_v53 = vsub.f32 %v1608_v49, %v1612_v52 }
 0xa4d   :  { %v1618_v54 = vmul.f32 1.442695, %v1616_v53  ;;  %v2349_v53 = vld [vmem:[%s3186_s2 + $0x125] ss:$0 sm:$0xff] }
 0xa4f   :  { %2734 = vpow2.f32 %v1618_v54 }
 0xa59   :  { %v2735_v55 = vpop.eup %2734 }
 0xa5a   :  { %v1622_v56 = vsel %vm207_vm2, %v2735_v55, 0.0 }
 0xa5b   :  { %1623 = vadd.xlane.f32.xlu0 %v1622_v56 }
 0xa8b   :  { %v1602_v57 = vpop.f32.mrb[10].mxu0 }
 0xa8c   :  { %v1607_v59 = vmul.f32 0.35355338, %v1602_v57  ;;  %v2539_v60 = vpop.f32.mrb[11].mxu0 }
 0xa8d   :  { %v28_v60 = vld [vmem:[%s3186_s2 + $0x48] sm:$0xff] }
 0xa8e   :  { %v1609_v61 = vadd.f32 %v1607_v59, %v2897_v51  ;;  %v27_v59 = vld [vmem:[%s3186_s2 + $0x40] sm:$0xff] }
 0xa90   :  { %v1613_v62 = vsel %vm207_vm2, %v1609_v61, -inf }
 0xa91   :  { %1614 = vmax.xlane.f32.xlu1 %v1613_v62  ;;  %v29_v62 = vld [vmem:[%s3186_s2 + $0x50] sm:$0xff] }
 0xaa2   :  { %1708 = vrot.lane.b32.xlu1 %v2879_v39, %s2808_s22 }
 0xae8   :  { %v1624_v4 = vpop.xlane.xlu0 %1623 }
 0xb1e   :  { %v1615_v58 = vpop.xlane.xlu1 %1614 }
 0xb1f   :  { %v1617_v63 = vsub.f32 %v1609_v61, %v1615_v58  ;;  %v2639_v61 = vpack.c.bf16 %v28_v60, %v27_v59  ;;  %v30_v58 = vld [vmem:[%s3186_s2 + $0x58] sm:$0xff] }
 0xb21   :  { %v1620_v0 = vmul.f32 1.442695, %v1617_v63  ;;  %v2643_v63 = vpack.c.bf16 %v30_v58, %v29_v62  ;;  %v48_v58 = vld [vmem:[%s3186_s2 + $0xe8] sm:$0xff] }
 0xb22   :  { %v1709_v1 = vpop.permute.xlu1 %1708 }
 0xb23   :  { %2736 = vpow2.f32 %v1620_v0  ;;  %2546 = vmatpush3.msra.mxu0 %v1709_v1  ;;  %v31_v0 = vld [vmem:[%s3186_s2 + $0x60] sm:$0xff]  ;;  %v32_v1 = vld [vmem:[%s3186_s2 + $0x68] sm:$0xff] }
 0xb24   :  { %2738 = vrcp.f32 %v1624_v4  ;;  %2550 = vmatprep.subr.mxu0 %v46_v9  ;;  %v34_v4 = vld [vmem:[%s3186_s2 + $0x78] sm:$0xff] }
 0xb2d   :  { %v2737_v2 = vpop.eup %2736 }
 0xb2e   :  { %v1625_v3 = vsel %vm207_vm2, %v2737_v2, 0.0  ;;  %v2739_v5 = vpop.eup %2738 }
 0xb2f   :  { %1626 = vadd.xlane.f32.xlu0 %v1625_v3  ;;  %v1630_v6 = vmul.f32 %v2739_v5, %v2735_v55  ;;  %v33_v3 = vld [vmem:[%s3186_s2 + $0x70] sm:$0xff]  ;;  %v35_v5 = vld [vmem:[%s3186_s2 + $0x80] sm:$0xff] }
 0xb45   :  { %1632 = vrot.lane.b32.xlu0 %v2881_v41, %s2808_s22 }
 0xbbc   :  { %v1627_v51 = vpop.xlane.xlu0 %1626 }
 0xbbd   :  { %2740 = vrcp.f32 %v1627_v51  ;;  %v2651_v51 = vpack.c.bf16 %v34_v4, %v33_v3 }
 0xbc0   :  { %v1633_v7 = vpop.permute.xlu0 %1632 }
 0xbc1   :  { %2541 = vmatpush3.msra.mxu1 %v1633_v7  ;;  %v37_v7 = vld [vmem:[%s3186_s2 + $0x90] sm:$0xff] }
 0xbc2   :  { %2543 = vmatmul.mubr.msk.f32.vlgmr.msra.gmra.mrb[20].mxu1 %vm207_vm2, %v1630_v6  ;;  %v36_v6 = vld [vmem:[%s3186_s2 + $0x88] sm:$0xff] }
 0xbc7   :  { %v2741_v39 = vpop.eup %2740 }
 0xbc8   :  { %v1631_v8 = vmul.f32 %v2741_v39, %v2737_v2  ;;  %v2647_v2 = vpack.c.bf16 %v32_v1, %v31_v0  ;;  %v2655_v39 = vpack.c.bf16 %v36_v6, %v35_v5  ;;  %v49_v0 = vld [vmem:[%s3186_s2 + $0xf0] sm:$0xff]  ;;  %v50_v1 = vld [vmem:[%s3186_s2 + $0xf8] sm:$0xff] }
 0xbc9   :  { %v2675_v3 = vpack.c.bf16 %v50_v1, %v49_v0 }
 0xbca   :  { %2548 = vmatmul.mubr.msk.f32.vlgmr.msra.gmra.mrb[12].mxu0 %vm207_vm2, %v1631_v8  ;;  %v38_v8 = vld [vmem:[%s3186_s2 + $0x98] sm:$0xff] }
 0xbcb   :  { %2551 = vmatpush3.msra.mxu0 %v46_v9  ;;  %v2659_v9 = vpack.c.bf16 %v38_v8, %v37_v7 }
 0xbcc   :  { %2640 = vmatprep.subr.bf16.mxu0 %v2639_v61 }
 0xc95   :  { %v1704_v41 = vpop.f32.mrb[20].mxu1 }
 0xc96   :  { %v2544_v10 = vpop.f32.mrb[21].mxu1  ;;  %2552 = vmatprep.mubr.msk.f32.mxu0 %vm207_vm2, %v1704_v41  ;;  %v39_v41 = vld [vmem:[%s3186_s2 + $0xa0] sm:$0xff] }
 0xc97   :  { %v40_v10 = vld [vmem:[%s3186_s2 + $0xa8] sm:$0xff] }
 0xc9d   :  { %v1780_v11 = vpop.f32.mrb[12].mxu0 }
 0xc9e   :  { %v2549_v12 = vpop.f32.mrb[13].mxu0  ;;  %2553 = vmatmul.mubr.msk.f32.vlgmr.msra.gmra.mrb[6].mxu0 %vm207_vm2, %v1780_v11  ;;  %v2663_v11 = vpack.c.bf16 %v40_v10, %v39_v41 }
 0xc9f   :  { %2642 = vmatpush3.bf16.msra.mxu0 %v2639_v61  ;;  %v41_v12 = vld [vmem:[%s3186_s2 + $0xb0] sm:$0xff] }
 0xca0   :  { %2644 = vmatprep.subr.bf16.mxu0 %v2643_v63 }
 0xca3   :  { %2646 = vmatpush3.bf16.msra.mxu0 %v2643_v63 }
 0xca4   :  { %2648 = vmatprep.subr.bf16.mxu0 %v2647_v2 }
 0xca7   :  { %2650 = vmatpush3.bf16.msra.mxu0 %v2647_v2  ;;  %v2809_v2 = vmov 0.0|0.0  }
 0xca8   :  { %2652 = vmatprep.subr.bf16.mxu0 %v2651_v51 }
 0xcab   :  { %2654 = vmatpush3.bf16.msra.mxu0 %v2651_v51 }
 0xcac   :  { %2656 = vmatprep.subr.bf16.mxu0 %v2655_v39 }
 0xcaf   :  { %2658 = vmatpush3.bf16.msra.mxu0 %v2655_v39 }
 0xcb0   :  { %2660 = vmatprep.subr.bf16.mxu0 %v2659_v9 }
 0xcb3   :  { %2662 = vmatpush3.bf16.msra.mxu0 %v2659_v9  ;;  %v2354_v9 = vld [vmem:[%s3186_s2 + $0x128] ss:$0 sm:$0xff] }
 0xcb4   :  { %2664 = vmatprep.subr.bf16.mxu0 %v2663_v11 }
 0xcb7   :  { %2666 = vmatpush3.bf16.msra.mxu0 %v2663_v11 }
 0xd71   :  { %v2554_v14 = vpop.f32.mrb[6].mxu0 }
 0xd72   :  { %v1872_v15 = vadd.f32 %v2554_v14, %v2347_v13  ;;  %v1856_v16 = vpop.f32.mrb[7].mxu0 }
 0xd73   :  { %v1871_v17 = vadd.f32 %v2347_v13, %v1856_v16  ;;  %v42_v13 = vld [vmem:[%s3186_s2 + $0xb8] sm:$0xff] }
 0xd74   :  { %v1874_v18 = vadd.f32 %v1872_v15, %v2866_v35  ;;  %v2667_v14 = vpack.c.bf16 %v42_v13, %v41_v12  ;;  %v2350_v15 = vld [vmem:[%s3186_s2 + $0x126] ss:$0 sm:$0xff]  ;;  %v2355_v12 = vld [vmem:[%s3186_s2 + $0x129] ss:$0 sm:$0xff] }
 0xd75   :  { %v1873_v20 = vadd.f32 %v1871_v17, %v2862_v33  ;;  %v23_v33 = vld [vmem:[%s3186_s2 + $0x20] sm:$0xff] }
 0xd76   :  { %v1878_v21 = vsel %vm69_vm0, %v1874_v18, 0.0  ;;  %v2631_v19 = vpack.c.bf16 %v24_v32, %v23_v33  ;;  %2668 = vmatprep.subr.bf16.mxu0 %v2667_v14 }
 0xd77   :  { %1879 = vadd.xlane.f32.xlu0 %v1878_v21  ;;  %v1875_v22 = vsel %vm69_vm0, %v1873_v20, 0.0  ;;  %2670 = vmatpush3.bf16.msra.mxu0 %v2667_v14 }
 0xd78   :  { %1876 = vadd.xlane.f32.xlu1 %v1875_v22  ;;  %2632 = vmatprep.subr.bf16.mxu1 %v2631_v19 }
 0xd79   :  { %2634 = vmatpush3.bf16.msra.mxu1 %v2631_v19 }
 0xd7a   :  { %2636 = vmatprep.subr.bf16.mxu1 %v2635_v38 }
 0xd7d   :  { %2638 = vmatpush3.bf16.msra.mxu1 %v2635_v38 }
 0xd7e   :  { %2671 = vmatprep.subr.bf16.mxu1 %v2809_v2 }
 0xe04   :  { %v1880_v23 = vpop.xlane.xlu0 %1879 }
 0xe05   :  { %v1882_v24 = vmul.f32 0.03125, %v1880_v23  ;;  %v1877_v25 = vpop.xlane.xlu1 %1876 }
 0xe06   :  { %v1881_v27 = vmul.f32 0.03125, %v1877_v25 }
 0xe07   :  { %v1884_v28 = vsub.f32 %v1874_v18, %v1882_v24 }
 0xe08   :  { %v1883_v29 = vsub.f32 %v1873_v20, %v1881_v27 }
 0xe09   :  { %v1886_v30 = vmul.f32 %v1884_v28, %v1884_v28 }
 0xe0a   :  { %v1885_v31 = vmul.f32 %v1883_v29, %v1883_v29 }
 0xe0b   :  { %v1890_v26 = vsel %vm69_vm0, %v1886_v30, 0.0 }
 0xe0c   :  { %1891 = vadd.xlane.f32.xlu1 %v1890_v26  ;;  %v1887_v35 = vsel %vm69_vm0, %v1885_v31, 0.0 }
 0xe0d   :  { %1888 = vadd.xlane.f32.xlu0 %v1887_v35 }
 0xe99   :  { %v1892_v40 = vpop.xlane.xlu1 %1891 }
 0xe9a   :  { %v1894_v42 = vmul.f32 0.03125, %v1892_v40  ;;  %v1889_v43 = vpop.xlane.xlu0 %1888  ;;  %v2353_v40 = vld [vmem:[%s3186_s2 + $0x127] ss:$0 sm:$0xff] }
 0xe9b   :  { %v1893_v44 = vmul.f32 0.03125, %v1889_v43 }
 0xe9c   :  { %v1896_v45 = vadd.f32 1e-12, %v1894_v42 }
 0xe9d   :  { %v1895_v46 = vadd.f32 1e-12, %v1893_v44 }
 0xe9e   :  { %2742 = vrsqrt.f32 %v1896_v45 }
 0xe9f   :  { %2744 = vrsqrt.f32 %v1895_v46 }
 0xea8   :  { %v2743_v47 = vpop.eup %2742 }
 0xea9   :  { %v2745_v49 = vpop.eup %2744  ;;  %v1900_v50 = vmul.f32 %v2743_v47, %v1884_v28 }
 0xeaa   :  { %v1899_v52 = vmul.f32 %v2745_v49, %v1883_v29 }
 0xeab   :  { %v1906_v54 = vmul.f32 %v2348_v48, %v1900_v50 }
 0xeac   :  { %v1905_v55 = vmul.f32 %v2348_v48, %v1899_v52 }
 0xead   :  { %v3064_v57 = vadd.f32 %v2349_v53, %v1906_v54 }
 0xeae   :  { %v3062_v56 = vadd.f32 %v2349_v53, %v1905_v55 }
 0xeb0   :  { %2563 = vmatprep.mubr.msk.f32.mxu1 %vm69_vm0, %v3062_v56 }
 0xeb1   :  { %2564 = vmatmul.mubr.msk.f32.vlgmr.msra.gmra.mrb[22].mxu1 %vm69_vm0, %v3064_v57 }
 0xeb2   :  { %2609 = vmatprep.mubr.msk.f32.mxu1 %vm2796_vm1, %v2795_v36 }
 0xf84   :  { %v2565_v16 = vpop.f32.mrb[22].mxu1 }
 0xf85   :  { %v1995_v17 = vadd.f32 %v2565_v16, %v2350_v15  ;;  %v1989_v18 = vpop.f32.mrb[23].mxu1 }
 0xf86   :  { %v1990_v20 = vadd.f32 %v2350_v15, %v1989_v18 }
 0xf87   :  { %v1999_v21 = vmul.f32 %v1995_v17, %v1995_v17 }
 0xf88   :  { %v1998_v22 = vmul.f32 %v1990_v20, %v1990_v20 }
 0xf89   :  { %v2001_v23 = vmul.f32 %v1999_v21, %v1995_v17  ;;  %v52_v21 = vld [vmem:[%s3186_s2 + $0x108] sm:$0xff] }
 0xf8a   :  { %v2000_v24 = vmul.f32 %v1998_v22, %v1990_v20  ;;  %v53_v22 = vld [vmem:[%s3186_s2 + $0x110] sm:$0xff] }
 0xf8b   :  { %v2003_v25 = vmul.f32 0.044715, %v2001_v23 }
 0xf8c   :  { %v2002_v27 = vmul.f32 0.044715, %v2000_v24  ;;  %v54_v24 = vld [vmem:[%s3186_s2 + $0x118] sm:$0xff] }
 0xf8d   :  { %v2005_v28 = vadd.f32 %v2003_v25, %v1995_v17  ;;  %v2681_v25 = vpack.c.bf16 %v54_v24, %v53_v22 }
 0xf8e   :  { %v2004_v29 = vadd.f32 %v2002_v27, %v1990_v20 }
 0xf8f   :  { %v2007_v30 = vmul.f32 0.7978846, %v2005_v28 }
 0xf90   :  { %v2006_v31 = vmul.f32 0.7978846, %v2004_v29 }
 0xf91   :  { %2746 = vtanh.f32 %v2007_v30 }
 0xf92   :  { %2748 = vtanh.f32 %v2006_v31  ;;  %v2358_v31 = vld [vmem:[%s3186_s2 + $0x12b] ss:$0 sm:$0xff] }
 0xf9b   :  { %v2747_v26 = vpop.eup %2746 }
 0xf9c   :  { %v2749_v35 = vpop.eup %2748  ;;  %v2011_v33 = vadd.f32 1.0, %v2747_v26 }
 0xf9d   :  { %v2010_v32 = vadd.f32 1.0, %v2749_v35 }
 0xf9e   :  { %v2013_v19 = vmul.f32 0.5, %v2011_v33 }
 0xf9f   :  { %v2012_v34 = vmul.f32 0.5, %v2010_v32 }
 0xfa0   :  { %v2015_v38 = vmul.f32 %v2013_v19, %v1995_v17 }
 0xfa1   :  { %v2014_v37 = vmul.f32 %v2012_v34, %v1990_v20  ;;  %v51_v20 = vld [vmem:[%s3186_s2 + $0x100] sm:$0xff] }
 0xfa2   :  { %v2678_v23 = vpack.c.bf16 %v52_v21, %v51_v20 }
 0xfa3   :  { %2598 = vmatprep.mubr.f32.mxu0 %v2014_v37 }
 0xfa4   :  { %2599 = vmatmul.mubr.f32.vlgmr.msra.gmra.mrb[14].mxu0 %v2015_v38 }
0x1077   :  { %v2600_v42 = vpop.f32.mrb[14].mxu0 }
0x1078   :  { %v2092_v43 = vadd.f32 %v2600_v42, %v2353_v40  ;;  %v2086_v44 = vpop.f32.mrb[15].mxu0 }
0x1079   :  { %v2087_v45 = vadd.f32 %v2353_v40, %v2086_v44 }
0x107a   :  { %v2096_v46 = vadd.f32 %v2092_v43, %v3064_v57 }
0x107b   :  { %v2095_v47 = vadd.f32 %v2087_v45, %v3062_v56  ;;  %v47_v56 = vld [vmem:[%s3186_s2 + $0xe0] sm:$0xff] }
0x107c   :  { %v2100_v48 = vsel %vm69_vm0, %v2096_v46, 0.0  ;;  %v2672_v63 = vpack.c.bf16 %v48_v58, %v47_v56 }
0x107d   :  { %2101 = vadd.xlane.f32.xlu0 %v2100_v48  ;;  %v2097_v49 = vsel %vm69_vm0, %v2095_v47, 0.0 }
0x107e   :  { %2098 = vadd.xlane.f32.xlu1 %v2097_v49  ;;  %2673 = vmatpush3.bf16.msra.mxu1 %v2672_v63 }
0x107f   :  { %2674 = vmatprep.subr.bf16.mxu1 %v2809_v2 }
0x1082   :  { %2676 = vmatpush3.bf16.msra.mxu1 %v2675_v3 }
0x1083   :  { %2677 = vmatprep.subr.bf16.mxu1 %v2809_v2 }
0x110a   :  { %v2102_v50 = vpop.xlane.xlu0 %2101 }
0x110b   :  { %v2104_v52 = vmul.f32 0.03125, %v2102_v50  ;;  %v2099_v53 = vpop.xlane.xlu1 %2098 }
0x110c   :  { %v2103_v54 = vmul.f32 0.03125, %v2099_v53 }
0x110d   :  { %v2106_v55 = vsub.f32 %v2096_v46, %v2104_v52 }
0x110e   :  { %v2105_v59 = vsub.f32 %v2095_v47, %v2103_v54 }
0x110f   :  { %v2108_v60 = vmul.f32 %v2106_v55, %v2106_v55 }
0x1110   :  { %v2107_v61 = vmul.f32 %v2105_v59, %v2105_v59 }
0x1111   :  { %v2112_v62 = vsel %vm69_vm0, %v2108_v60, 0.0 }
0x1112   :  { %2113 = vadd.xlane.f32.xlu0 %v2112_v62  ;;  %v2109_v57 = vsel %vm69_vm0, %v2107_v61, 0.0 }
0x1113   :  { %2110 = vadd.xlane.f32.xlu1 %v2109_v57 }
0x119f   :  { %v2114_v4 = vpop.xlane.xlu0 %2113 }
0x11a0   :  { %v2116_v51 = vmul.f32 0.03125, %v2114_v4  ;;  %v2111_v5 = vpop.xlane.xlu1 %2110 }
0x11a1   :  { %v2115_v6 = vmul.f32 0.03125, %v2111_v5 }
0x11a2   :  { %v2118_v7 = vadd.f32 1e-12, %v2116_v51 }
0x11a3   :  { %v2117_v39 = vadd.f32 1e-12, %v2115_v6 }
0x11a4   :  { %2750 = vrsqrt.f32 %v2118_v7 }
0x11a5   :  { %2752 = vrsqrt.f32 %v2117_v39 }
0x11ae   :  { %v2751_v8 = vpop.eup %2750 }
0x11af   :  { %v2753_v41 = vpop.eup %2752  ;;  %v2122_v10 = vmul.f32 %v2751_v8, %v2106_v55 }
0x11b0   :  { %v2121_v11 = vmul.f32 %v2753_v41, %v2105_v59 }
0x11b1   :  { %v2128_v13 = vmul.f32 %v2354_v9, %v2122_v10 }
0x11b2   :  { %v2127_v14 = vmul.f32 %v2354_v9, %v2121_v11 }
0x11b3   :  { %v2134_v15 = vadd.f32 %v2355_v12, %v2128_v13 }
0x11b4   :  { %v2133_v16 = vadd.f32 %v2355_v12, %v2127_v14 }
0x11b5   :  { %v2141_v17 = vrot.slane %v2134_v15, 7 }
0x11b7   :  { %v2143_v18 = vsel %vm2142_vm5, %v2141_v17, %v2133_v16 }
0x11b8   :  { %2610 = vmatmul.mubr.msk.f32.vlgmr.msra.gmra.mrb[24].mxu1 %vm69_vm0, %v2143_v18 }
0x11b9   :  { %2620 = vmatprep.mubr.msk.f32.mxu1 %vm2796_vm1, %v2795_v36  ;;  %2679 = vmatpush3.bf16.msra.mxu1 %v2678_v23  ;;  %v2356_v36 = vld [vmem:[%s3186_s2 + $0x12a] ss:$0 sm:$0xff] }
0x11ba   :  { %2680 = vmatprep.subr.bf16.mxu1 %v2809_v2 }
0x11bd   :  { %2682 = vmatpush3.bf16.msra.mxu1 %v2681_v25 }
0x128b   :  { %v2212_v27 = vpop.f32.mrb[24].mxu1 }
0x128c   :  { %v2213_v28 = vadd.f32 %v2356_v36, %v2212_v27  ;;  %v2611_v29 = vpop.f32.mrb[25].mxu1 }
0x128e   :  { %2754 = vtanh.f32 %v2213_v28 }
0x1298   :  { %v2755_v30 = vpop.eup %2754 }
0x1299   :  { %2621 = vmatmul.mubr.msk.f32.vlgmr.msra.gmra.mrb[26].mxu1 %vm69_vm0, %v2755_v30 }
0x136c   :  { %v2290_v26 = vpop.f32.mrb[26].mxu1 }
0x136d   :  { %v2291_v35 = vadd.f32 %v2358_v31, %v2290_v26  ;;  %v2622_v33 = vpop.f32.mrb[27].mxu1 }
0x136f   :  { %2294 = vst [vmem:[#allocation4] sm:$0x3] %v2291_v35 }
0x1370   :  { %2779 = shalt.err (!%p2776_p9)
}
0x1371   :  { %s2780_s19 = scalar_lea.hbm %s3187_s3, 32 }
0x1372   :  { %p2781_p10 = scmp.ne.s32.totalorder %s3187_s3, %s2780_s19  ;;  %p2784_p11 = scmp.lt.u32.totalorder %s2780_s19, %s3187_s3 }
0x1374   :  { %p2786_p12 = pnand %p2784_p11, %p2781_p10 }
0x1376   :  { %2789 = shalt.err (!%p2786_p12)
}
0x1377   :  { %2304 = dma.vmem_to_hbm [thread:$0]  %s2302_s15, 32, %s3187_s3, [#allocation5]  }
0x1378   :  { %2792 = dma.done.wait [#allocation5], 32  }
0x1379   :  { %2793 = vsyncadd [#allocation5], 4294967264 }
0x137a   :  { %2308 = vsyncpa [#allocation5], 1 }

</bundles_post_ra>
